<compile_context>
chip_gen: v7x
topology: tpu7x:2x2x1
jax: 0.10.0
libtpu: 0.0.40
codegen_flags: <defaults>
</compile_context>

<pallas_src>
import math

import jax
import jax.numpy as jnp
from jax.experimental import pallas as pl
from jax.experimental.pallas import tpu as pltpu

EPS = 1e-5  # torch.nn.LayerNorm default


# ----------------------------- in-kernel helpers -----------------------------

def _layernorm(x, w, b=None, eps=EPS):
    mean = jnp.mean(x, axis=-1, keepdims=True)
    var = jnp.mean((x - mean) ** 2, axis=-1, keepdims=True)
    y = (x - mean) * jax.lax.rsqrt(var + eps) * w
    if b is not None:
        y = y + b
    return y


def _erf(x):
    # float32-accurate erf (Abramowitz & Stegun 7.1.26, |err| < 1.5e-7);
    # uses only exp/mul/add so it lowers cleanly inside Mosaic.
    a1, a2, a3, a4, a5 = 0.254829592, -0.284496736, 1.421413741, -1.453152027, 1.061405429
    p = 0.3275911
    z = jnp.abs(x)
    t = 1.0 / (1.0 + p * z)
    poly = ((((a5 * t + a4) * t + a3) * t + a2) * t + a1) * t
    r = 1.0 - poly * jnp.exp(-z * z)
    return jnp.where(x >= 0.0, r, -r)


def _gelu_exact(x):
    # nn.GELU() default (erf-based "exact" gelu)
    return 0.5 * x * (1.0 + _erf(x * (1.0 / math.sqrt(2.0))))


# ------------------------ packed parameter slab layout ------------------------

def _slab_layout(d, e, mlp):
    """Row layout of the per-layer (R, 128) small-parameter slab."""
    assert d <= 128 and mlp <= 128 and (e + 2) <= 128, (
        "TODO(synk): multi-row slab fields needed for production-sized dims")
    layout = {}
    row = 0

    def alloc(name, r, c):
        nonlocal row
        layout[name] = (row, r, c)
        row += r

    alloc("hc_ln_attn", 1, d)      # HyperConnection LN weight (attention half)
    alloc("hc_ln_ff", 1, d)        # HyperConnection LN weight (FF half)
    alloc("attn_ln", 2, d)         # attention LayerNorm [weight, bias]
    alloc("ff_ln", 2, d)           # feed-forward LayerNorm [weight, bias]
    alloc("b1", 1, mlp)            # FF first bias
    alloc("b2", 1, d)              # FF second bias
    alloc("stat_attn", e, e + 2)   # cols 0..e: static_alpha, col e+1: static_beta
    alloc("stat_ff", e, e + 2)
    alloc("scales", 1, 4)          # [a_scale_attn, b_scale_attn, a_scale_ff, b_scale_ff]
    return layout, row


def pack_params(params, heads, dim_head, e):
    layers = params["layers"]
    d = params["final_norm_w"].shape[0]
    mlp = layers[0][3]["b1"].shape[0]
    layout, used_rows = _slab_layout(d, e, mlp)
    n_rows = ((used_rows + 7) // 8) * 8   # sublane-friendly slab height

    def fill(slab, name, value):
        r0, r, c = layout[name]
        return slab.at[r0:r0 + r, :c].set(jnp.asarray(value, jnp.float32).reshape(r, c))

    def stat(hc):
        return jnp.concatenate([hc["static_alpha"], hc["static_beta"][:, None]], axis=1)

    def dyn(hc):
        return jnp.concatenate([hc["dyn_alpha_fn"], hc["dyn_beta_fn"][:, None]], axis=1)

    slabs, dyns, wqkvs, wos, w1s, w2s = [], [], [], [], [], []
    for attn_hc, attn_p, ff_hc, ff_p in layers:
        s = jnp.zeros((n_rows, 128), jnp.float32)
        s = fill(s, "hc_ln_attn", attn_hc["norm_w"])
        s = fill(s, "hc_ln_ff", ff_hc["norm_w"])
        s = fill(s, "attn_ln", jnp.stack([attn_p["ln_w"], attn_p["ln_b"]]))
        s = fill(s, "ff_ln", jnp.stack([ff_p["ln_w"], ff_p["ln_b"]]))
        s = fill(s, "b1", ff_p["b1"])
        s = fill(s, "b2", ff_p["b2"])
        s = fill(s, "stat_attn", stat(attn_hc))
        s = fill(s, "stat_ff", stat(ff_hc))
        s = fill(s, "scales", jnp.stack([attn_hc["dyn_alpha_scale"], attn_hc["dyn_beta_scale"],
                                         ff_hc["dyn_alpha_scale"], ff_hc["dyn_beta_scale"]]))
        slabs.append(s)
        dyns.append(jnp.concatenate([dyn(attn_hc), dyn(ff_hc)], axis=1))  # (D, 2*(E+2))
        wqkvs.append(attn_p["w_qkv"])                                     # (D, 3*inner)
        wos.append(attn_p["w_out"])                                       # (inner, D)
        w1s.append(ff_p["w1"])                                            # (D, mlp)
        w2s.append(ff_p["w2"])                                            # (mlp, D)

    packed = dict(
        slab=jnp.stack(slabs),      # (L, R, 128)
        dyn=jnp.stack(dyns),        # (L, D, 2*(E+2))
        wqkv=jnp.stack(wqkvs),      # (L, D, 3*inner)
        wo=jnp.stack(wos),          # (L, inner, D)
        w1=jnp.stack(w1s),          # (L, D, mlp)
        w2=jnp.stack(w2s),          # (L, mlp, D)
        final_ln=jnp.stack([params["final_norm_w"], params["final_norm_b"]]),  # (2, D)
    )
    return packed, layout


# --------------------------- fused transformer kernel -------------------------

def _make_kernel(n, d, e, heads, dim_head, bb, layout):
    inner = heads * dim_head
    rows = bb * n                       # batch folded into the token axis
    scale = dim_head ** -0.5
    ecols = e + 2                       # columns per hyper-connection half in the fused dyn proj

    def fld(slab, name):
        r0, r, c = layout[name]
        return slab[r0:r0 + r, :c] if r > 1 else slab[r0, :c]

    # ---- HyperConnection.width_connection (depth connection fused by caller) ----
    def width(res, ln_w, dyn_full, col0, stat, a_sc, b_sc):
        normed = _layernorm(res, ln_w)                                    # (e, rows, d)
        proj = jnp.tanh(jnp.dot(normed.reshape(e * rows, d), dyn_full,
                                preferred_element_type=jnp.float32))      # (e*rows, 2*ecols)
        proj = proj.reshape(e, rows, 2 * ecols)
        alpha = proj[:, :, col0:col0 + e + 1] * a_sc + stat[:, None, :e + 1]          # (e, rows, e+1)
        beta = proj[:, :, col0 + e + 1:col0 + e + 2] * b_sc + stat[:, None, e + 1:e + 2]  # (e, rows, 1)
        # mix[j] = sum_i alpha[i, :, j] * res[i]  -- tiny, unrolled full-tile VPU FMAs
        mix = []
        for j in range(e + 1):
            acc = alpha[0, :, j:j + 1] * res[0]
            for i in range(1, e):
                acc = acc + alpha[i, :, j:j + 1] * res[i]
            mix.append(acc)
        keep = jnp.stack(mix[1:], axis=0)                                 # (e, rows, d)
        return mix[0], keep, beta                                         # branch, kept res, beta

    # ---- Attention: one QKV matmul, one output matmul ----
    def attention(xb, ln_w, ln_b, wqkv, wo):
        xn = _layernorm(xb, ln_w, ln_b)                                   # (rows, d)
        qkv = jnp.dot(xn, wqkv, preferred_element_type=jnp.float32)       # (rows, 3*inner)

        def heads_major(t):  # (rows, inner) -> (bb*heads, n, dim_head)
            parts = []
            for b_ in range(bb):
                tb = t[b_ * n:(b_ + 1) * n]
                for h in range(heads):
                    parts.append(tb[:, h * dim_head:(h + 1) * dim_head])
            return jnp.stack(parts, axis=0)

        q = heads_major(qkv[:, :inner])
        k = heads_major(qkv[:, inner:2 * inner])
        v = heads_major(qkv[:, 2 * inner:])
        dots = jnp.einsum('bqd,bkd->bqk', q, k,
                          preferred_element_type=jnp.float32) * scale     # (bb*H, n, n)
        dots = dots - jnp.max(dots, axis=-1, keepdims=True)
        p = jnp.exp(dots)
        probs = p / jnp.sum(p, axis=-1, keepdims=True)                    # exact softmax
        o = jnp.einsum('bqk,bkd->bqd', probs, v,
                       preferred_element_type=jnp.float32)                # (bb*H, n, dh)
        # re-concatenate heads along lanes, then a single output projection
        per_batch = []
        for b_ in range(bb):
            per_batch.append(jnp.concatenate(
                [o[b_ * heads + h] for h in range(heads)], axis=1))       # (n, inner)
        om = per_batch[0] if bb == 1 else jnp.concatenate(per_batch, axis=0)
        return jnp.dot(om, wo, preferred_element_type=jnp.float32)        # (rows, d)

    # ---- FeedForward ----
    def feedforward(xb, ln_w, ln_b, w1, b1, w2, b2):
        xn = _layernorm(xb, ln_w, ln_b)
        h = _gelu_exact(jnp.dot(xn, w1, preferred_element_type=jnp.float32) + b1)
        return jnp.dot(h, w2, preferred_element_type=jnp.float32) + b2

    def kernel(x_ref, slab_ref, dyn_ref, wqkv_ref, wo_ref, w1_ref, w2_ref,
               fln_ref, out_ref, res_ref):
        layer = pl.program_id(1)

        # First layer for this batch block: residual streams = repeat of x.
        @pl.when(layer == 0)
        def _init():
            x0 = x_ref[...].reshape(rows, d)
            res_ref[...] = jnp.broadcast_to(x0[None], (e, rows, d))

        res = res_ref[...]                                                # (e, rows, d)
        slab = slab_ref[0]                                                # (R, 128)
        dyn = dyn_ref[0]                                                  # (d, 2*ecols)
        sc = fld(slab, "scales")                                          # (4,)

        # ---------------- attention half ----------------
        branch, keep, beta = width(res, fld(slab, "hc_ln_attn"), dyn, 0,
                                   fld(slab, "stat_attn"), sc[0:1], sc[1:2])
        aln = fld(slab, "attn_ln")
        y = attention(branch, aln[0], aln[1], wqkv_ref[0], wo_ref[0])
        res = keep + beta * y[None, :, :]                                 # fused depth_connection

        # ---------------- feed-forward half ----------------
        branch, keep, beta = width(res, fld(slab, "hc_ln_ff"), dyn, ecols,
                                   fld(slab, "stat_ff"), sc[2:3], sc[3:4])
        fln2 = fld(slab, "ff_ln")
        y = feedforward(branch, fln2[0], fln2[1], w1_ref[0], fld(slab, "b1"),
                        w2_ref[0], fld(slab, "b2"))
        res = keep + beta * y[None, :, :]                                 # fused depth_connection

        res_ref[...] = res

        # Last layer: sum streams + final LayerNorm, stored as a lane-dense slab.
        @pl.when(layer == pl.num_programs(1) - 1)
        def _final():
            fl = fln_ref[...]
            out = _layernorm(jnp.sum(res, axis=0), fl[0], fl[1])          # (rows, d)
            out_rows = []
            for b_ in range(bb):
                ob = out[b_ * n:(b_ + 1) * n]
                out_rows.append(jnp.concatenate(
                    [ob[i:i + 1, :] for i in range(n)], axis=1))          # (1, n*d)
            out_ref[...] = jnp.stack(out_rows, axis=0)                    # (bb, 1, n*d)

    return kernel


# ------------------------------ full forward ----------------------------------

def transformer_forward(x, params, heads, dim_head, num_residual_streams,
                        batch_block=None):
    b, n, d = x.shape
    e = num_residual_streams
    inner = heads * dim_head

    if batch_block is None:
        # Fold batch into the block to amortise per-layer weight DMA, while
        # keeping >= 2 parallel blocks so a v7x megacore can use both cores.
        batch_block = b // 2 if (b >= 2 and b % 2 == 0) else b
    bb = batch_block
    assert b % bb == 0

    packed, layout = pack_params(params, heads, dim_head, e)
    num_layers = packed["slab"].shape[0]
    n_rows = packed["slab"].shape[1]
    mlp = packed["w1"].shape[-1]

    kernel = _make_kernel(n, d, e, heads, dim_head, bb, layout)

    grid_spec = pltpu.PrefetchScalarGridSpec(
        num_scalar_prefetch=0,
        grid=(b // bb, num_layers),
        in_specs=[
            pl.BlockSpec((bb, n, d), lambda bi, li: (bi, 0, 0)),             # x (resident across layers)
            pl.BlockSpec((1, n_rows, 128), lambda bi, li: (li, 0, 0)),       # packed small params
            pl.BlockSpec((1, d, 2 * (e + 2)), lambda bi, li: (li, 0, 0)),    # fused dyn alpha/beta proj
            pl.BlockSpec((1, d, 3 * inner), lambda bi, li: (li, 0, 0)),      # wqkv
            pl.BlockSpec((1, inner, d), lambda bi, li: (li, 0, 0)),          # wo
            pl.BlockSpec((1, d, mlp), lambda bi, li: (li, 0, 0)),            # w1
            pl.BlockSpec((1, mlp, d), lambda bi, li: (li, 0, 0)),            # w2
            pl.BlockSpec((2, d), lambda bi, li: (0, 0)),                     # final LN (w, b)
        ],
        out_specs=pl.BlockSpec((bb, 1, n * d), lambda bi, li: (bi, 0, 0)),
        scratch_shapes=[pltpu.VMEM((e, bb * n, d), jnp.float32)],            # residual streams (per-core)
    )

    out = pl.pallas_call(
        kernel,
        out_shape=jax.ShapeDtypeStruct((b, 1, n * d), jnp.float32),
        grid_spec=grid_spec,
        compiler_params=pltpu.CompilerParams(
            dimension_semantics=("parallel", "arbitrary")),
    )(x, packed["slab"], packed["dyn"], packed["wqkv"], packed["wo"],
      packed["w1"], packed["w2"], packed["final_ln"])

    return out.reshape(b, n, d)


# ------------------------------ params init -----------------------------------

def init_params(key, dim, depth, heads, dim_head, mlp_dim, e):
    inner = heads * dim_head
    layers = []
    for li in range(depth):
        key, k0, k1, k2, k3, k4, k5, k6, k7 = jax.random.split(key, 9)

        def hc_params(ka, kb):
            a0 = jnp.zeros((e, 1), jnp.float32).at[li % e, 0].set(1.0)
            return {
                "norm_w": jnp.ones((dim,), jnp.float32),
                "static_alpha": jnp.concatenate([a0, jnp.eye(e, dtype=jnp.float32)], axis=1),
                # NOTE: module __init__ zeros these; small random values are used
                # so the dynamic path is actually exercised (still deterministic).
                "dyn_alpha_fn": 0.02 * jax.random.normal(ka, (dim, e + 1), jnp.float32),
                "dyn_beta_fn": 0.02 * jax.random.normal(kb, (dim,), jnp.float32),
                "dyn_alpha_scale": jnp.array(0.01, jnp.float32),
                "dyn_beta_scale": jnp.array(0.01, jnp.float32),
                "static_beta": jnp.ones((e,), jnp.float32),
            }

        attn_hc = hc_params(k0, k1)
        ff_hc = hc_params(k2, k3)
        attn_p = {
            "ln_w": jnp.ones((dim,), jnp.float32),
            "ln_b": jnp.zeros((dim,), jnp.float32),
            "w_qkv": 0.02 * jax.random.normal(k4, (dim, 3 * inner), jnp.float32),
            "w_out": 0.02 * jax.random.normal(k5, (inner, dim), jnp.float32),
        }
        ff_p = {
            "ln_w": jnp.ones((dim,), jnp.float32),
            "ln_b": jnp.zeros((dim,), jnp.float32),
            "w1": 0.02 * jax.random.normal(k6, (dim, mlp_dim), jnp.float32),
            "b1": jnp.zeros((mlp_dim,), jnp.float32),
            "w2": 0.02 * jax.random.normal(k7, (mlp_dim, dim), jnp.float32),
            "b2": jnp.zeros((dim,), jnp.float32),
        }
        layers.append((attn_hc, attn_p, ff_hc, ff_p))
    return {"layers": layers,
            "final_norm_w": jnp.ones((dim,), jnp.float32),
            "final_norm_b": jnp.zeros((dim,), jnp.float32)}


# --------------------------- pure-JAX reference --------------------------------

def _ref_ln(x, w, b=None, eps=EPS):
    m = x.mean(-1, keepdims=True)
    v = ((x - m) ** 2).mean(-1, keepdims=True)
    y = (x - m) / jnp.sqrt(v + eps) * w
    return y + b if b is not None else y


def ref_forward(x, params, heads, dim_head, e):
    b, n, d = x.shape
    inner = heads * dim_head
    xr = jnp.broadcast_to(x[:, :, None, :], (b, n, e, d))

    def width(res, hc):
        normed = _ref_ln(res, hc["norm_w"])
        alpha = jnp.tanh(normed @ hc["dyn_alpha_fn"]) * hc["dyn_alpha_scale"] + hc["static_alpha"]
        beta = jnp.tanh(normed @ hc["dyn_beta_fn"]) * hc["dyn_beta_scale"] + hc["static_beta"]
        mix = jnp.einsum("bnij,bnid->bnjd", alpha, res)
        return mix[:, :, 0, :], mix[:, :, 1:, :], beta

    def depth_conn(y, res, beta):
        return beta[:, :, :, None] * y[:, :, None, :] + res

    def attn_fn(z, p):
        zn = _ref_ln(z, p["ln_w"], p["ln_b"])
        qkv = zn @ p["w_qkv"]
        q, k, v = qkv[..., :inner], qkv[..., inner:2 * inner], qkv[..., 2 * inner:]
        sp = lambda t: t.reshape(b, n, heads, dim_head).transpose(0, 2, 1, 3)
        q, k, v = sp(q), sp(k), sp(v)
        dots = jnp.einsum("bhqd,bhkd->bhqk", q, k) * (dim_head ** -0.5)
        o = jnp.einsum("bhqk,bhkd->bhqd", jax.nn.softmax(dots, axis=-1), v)
        return o.transpose(0, 2, 1, 3).reshape(b, n, inner) @ p["w_out"]

    def ff_fn(z, p):
        zn = _ref_ln(z, p["ln_w"], p["ln_b"])
        h = jax.nn.gelu(zn @ p["w1"] + p["b1"], approximate=False)
        return h @ p["w2"] + p["b2"]

    for attn_hc, attn_p, ff_hc, ff_p in params["layers"]:
        br, res, beta = width(xr, attn_hc)
        xr = depth_conn(attn_fn(br, attn_p), res, beta)
        br, res, beta = width(xr, ff_hc)
        xr = depth_conn(ff_fn(br, ff_p), res, beta)
    return _ref_ln(xr.sum(axis=2), params["final_norm_w"], params["final_norm_b"])


# ----------------------------------- main --------------------------------------

if __name__ == "__main__":
    B, N, DIM = 2, 8, 32
    DEPTH, HEADS, DIM_HEAD, MLP_DIM, STREAMS = 2, 4, 16, 64, 4

    key = jax.random.PRNGKey(0)
    kx, kp = jax.random.split(key)
    x = jax.random.normal(kx, (B, N, DIM), jnp.float32)
    params = init_params(kp, DIM, DEPTH, HEADS, DIM_HEAD, MLP_DIM, STREAMS)

    fwd = jax.jit(lambda xx, pp: transformer_forward(xx, pp, HEADS, DIM_HEAD, STREAMS))
    out = jax.block_until_ready(fwd(x, params))
    assert out.shape == (B, N, DIM) and out.dtype == jnp.float32

    ref = ref_forward(x, params, HEADS, DIM_HEAD, STREAMS)
    max_err = float(jnp.max(jnp.abs(out - ref)))
    assert jnp.allclose(out, ref, atol=1e-3, rtol=1e-3), max_err

    print("KERNEL_OK")
</pallas_src>

<mosaic_0001>
module attributes {stable_mosaic.version = 11 : i64} {
  func.func @kernel(%arg0: i32, %arg1: i32, %arg2: memref<1x8x32xf32, #tpu.memory_space<vmem>>, %arg3: memref<1x24x128xf32, #tpu.memory_space<vmem>>, %arg4: memref<1x32x12xf32, #tpu.memory_space<vmem>>, %arg5: memref<1x32x192xf32, #tpu.memory_space<vmem>>, %arg6: memref<1x64x32xf32, #tpu.memory_space<vmem>>, %arg7: memref<1x32x64xf32, #tpu.memory_space<vmem>>, %arg8: memref<1x64x32xf32, #tpu.memory_space<vmem>>, %arg9: memref<2x32xf32, #tpu.memory_space<vmem>>, %arg10: memref<1x1x256xf32, #tpu.memory_space<vmem>>, %arg11: memref<4x8x32xf32, #tpu.memory_space<vmem>>) attributes {dimension_semantics = [#tpu.dimension_semantics<parallel>, #tpu.dimension_semantics<arbitrary>], iteration_bounds = array<i64: 2, 2>, scalar_prefetch = 0 : i64, scratch_operands = 1 : i64, tpu.core_type = #tpu.core_type<tc>, window_params = [{transform_indices = @transform_0, window_bounds = array<i64: 1, 8, 32>}, {transform_indices = @transform_1, window_bounds = array<i64: 1, 24, 128>}, {transform_indices = @transform_2, window_bounds = array<i64: 1, 32, 12>}, {transform_indices = @transform_3, window_bounds = array<i64: 1, 32, 192>}, {transform_indices = @transform_4, window_bounds = array<i64: 1, 64, 32>}, {transform_indices = @transform_5, window_bounds = array<i64: 1, 32, 64>}, {transform_indices = @transform_6, window_bounds = array<i64: 1, 64, 32>}, {pipeline_mode = #tpu.pipeline_mode<synchronous>, transform_indices = @transform_7, window_bounds = array<i64: 2, 32>}, {transform_indices = @transform_8, window_bounds = array<i64: 1, 1, 256>}]} {
    %c0_i32 = arith.constant 0 : i32
    %0 = arith.cmpi eq, %arg1, %c0_i32 : i32
    %1 = arith.extui %0 : i1 to i32
    %c0_i32_0 = arith.constant 0 : i32
    %2 = arith.cmpi ne, %1, %c0_i32_0 : i32
    scf.if %2 {
      %c0_70 = arith.constant 0 : index
      %c0_71 = arith.constant 0 : index
      %c0_72 = arith.constant 0 : index
      %568 = vector.load %arg2[%c0_70, %c0_71, %c0_72] : memref<1x8x32xf32, #tpu.memory_space<vmem>>, vector<1x8x32xf32>
      %569 = vector.shape_cast %568 : vector<1x8x32xf32> to vector<8x32xf32>
      %570 = vector.shape_cast %569 : vector<8x32xf32> to vector<1x8x32xf32>
      %571 = vector.shape_cast %570 : vector<1x8x32xf32> to vector<1x8x32xf32>
      %572 = vector.broadcast %571 : vector<1x8x32xf32> to vector<4x8x32xf32>
      %c0_73 = arith.constant 0 : index
      %c0_74 = arith.constant 0 : index
      %c0_75 = arith.constant 0 : index
      %573 = vector.load %arg11[%c0_73, %c0_74, %c0_75] : memref<4x8x32xf32, #tpu.memory_space<vmem>>, vector<4x8x32xf32>
      tpu.vector_store %arg11[%c0_73, %c0_74, %c0_75], %572 {strides = array<i32>} : memref<4x8x32xf32, #tpu.memory_space<vmem>>, vector<4x8x32xf32>,
    } else {
    }
    %c0 = arith.constant 0 : index
    %c0_1 = arith.constant 0 : index
    %c0_2 = arith.constant 0 : index
    %3 = vector.load %arg11[%c0, %c0_1, %c0_2] : memref<4x8x32xf32, #tpu.memory_space<vmem>>, vector<4x8x32xf32>
    %c0_3 = arith.constant 0 : index
    %c0_4 = arith.constant 0 : index
    %c0_5 = arith.constant 0 : index
    %4 = vector.load %arg3[%c0_3, %c0_4, %c0_5] : memref<1x24x128xf32, #tpu.memory_space<vmem>>, vector<1x24x128xf32>
    %5 = vector.shape_cast %4 : vector<1x24x128xf32> to vector<24x128xf32>
    %c0_6 = arith.constant 0 : index
    %c0_7 = arith.constant 0 : index
    %c0_8 = arith.constant 0 : index
    %6 = vector.load %arg4[%c0_6, %c0_7, %c0_8] : memref<1x32x12xf32, #tpu.memory_space<vmem>>, vector<1x32x12xf32>
    %7 = vector.shape_cast %6 : vector<1x32x12xf32> to vector<32x12xf32>
    %8 = vector.extract_strided_slice %5 {offsets = [16, 0], sizes = [1, 4], strides = [1, 1]} : vector<24x128xf32> to vector<1x4xf32>
    %9 = vector.shape_cast %8 : vector<1x4xf32> to vector<4xf32>
    %10 = vector.extract_strided_slice %5 {offsets = [0, 0], sizes = [1, 32], strides = [1, 1]} : vector<24x128xf32> to vector<1x32xf32>
    %11 = vector.shape_cast %10 : vector<1x32xf32> to vector<32xf32>
    %12 = vector.extract_strided_slice %5 {offsets = [8, 0], sizes = [4, 6], strides = [1, 1]} : vector<24x128xf32> to vector<4x6xf32>
    %13 = vector.extract_strided_slice %9 {offsets = [0], sizes = [1], strides = [1]} : vector<4xf32> to vector<1xf32>
    %14 = vector.extract_strided_slice %9 {offsets = [1], sizes = [1], strides = [1]} : vector<4xf32> to vector<1xf32>
    %cst = arith.constant dense<0.000000e+00> : vector<4x8xf32>
    %15 = vector.multi_reduction <add>, %3, %cst [2] : vector<4x8x32xf32> to vector<4x8xf32>
    %16 = vector.shape_cast %15 : vector<4x8xf32> to vector<4x8x1xf32>
    %cst_9 = arith.constant 3.200000e+01 : f32
    %17 = vector.broadcast %cst_9 : f32 to vector<4x8x1xf32>
    %18 = arith.divf %16, %17 : vector<4x8x1xf32>
    %19 = vector.broadcast %18 : vector<4x8x1xf32> to vector<4x8x32xf32>
    %20 = arith.subf %3, %19 : vector<4x8x32xf32>
    %21 = arith.mulf %20, %20 : vector<4x8x32xf32>
    %cst_10 = arith.constant dense<0.000000e+00> : vector<4x8xf32>
    %22 = vector.multi_reduction <add>, %21, %cst_10 [2] : vector<4x8x32xf32> to vector<4x8xf32>
    %23 = vector.shape_cast %22 : vector<4x8xf32> to vector<4x8x1xf32>
    %cst_11 = arith.constant 3.200000e+01 : f32
    %24 = vector.broadcast %cst_11 : f32 to vector<4x8x1xf32>
    %25 = arith.divf %23, %24 : vector<4x8x1xf32>
    %26 = vector.broadcast %18 : vector<4x8x1xf32> to vector<4x8x32xf32>
    %27 = arith.subf %3, %26 : vector<4x8x32xf32>
    %cst_12 = arith.constant 9.99999974E-6 : f32
    %28 = vector.broadcast %cst_12 : f32 to vector<4x8x1xf32>
    %29 = arith.addf %25, %28 : vector<4x8x1xf32>
    %30 = math.rsqrt %29 : vector<4x8x1xf32>
    %31 = vector.broadcast %30 : vector<4x8x1xf32> to vector<4x8x32xf32>
    %32 = arith.mulf %27, %31 : vector<4x8x32xf32>
    %33 = vector.shape_cast %11 : vector<32xf32> to vector<1x1x32xf32>
    %34 = vector.broadcast %33 : vector<1x1x32xf32> to vector<4x8x32xf32>
    %35 = arith.mulf %32, %34 : vector<4x8x32xf32>
    %36 = vector.shape_cast %35 : vector<4x8x32xf32> to vector<32x32xf32>
    %cst_13 = arith.constant dense<0.000000e+00> : vector<32x12xf32>
    %37 = tpu.matmul %36, %7, %cst_13 {dimension_numbers = #tpu.dot_dimension_numbers<[1], [0], [0], [1], [0, 0, 1, 1], [], []>} : vector<32x32xf32>, vector<32x12xf32>, vector<32x12xf32> -> vector<32x12xf32>
    %38 = math.tanh %37 : vector<32x12xf32>
    %39 = vector.shape_cast %38 : vector<32x12xf32> to vector<4x8x12xf32>
    %40 = vector.extract_strided_slice %39 {offsets = [0, 0, 0], sizes = [4, 8, 5], strides = [1, 1, 1]} : vector<4x8x12xf32> to vector<4x8x5xf32>
    %41 = vector.shape_cast %13 : vector<1xf32> to vector<1x1x1xf32>
    %42 = vector.broadcast %41 : vector<1x1x1xf32> to vector<4x8x5xf32>
    %43 = arith.mulf %40, %42 : vector<4x8x5xf32>
    %44 = vector.extract_strided_slice %12 {offsets = [0, 0], sizes = [4, 5], strides = [1, 1]} : vector<4x6xf32> to vector<4x5xf32>
    %45 = vector.shape_cast %44 : vector<4x5xf32> to vector<4x1x5xf32>
    %46 = vector.broadcast %45 : vector<4x1x5xf32> to vector<4x8x5xf32>
    %47 = arith.addf %43, %46 : vector<4x8x5xf32>
    %48 = vector.extract_strided_slice %39 {offsets = [0, 0, 5], sizes = [4, 8, 1], strides = [1, 1, 1]} : vector<4x8x12xf32> to vector<4x8x1xf32>
    %49 = vector.shape_cast %14 : vector<1xf32> to vector<1x1x1xf32>
    %50 = vector.broadcast %49 : vector<1x1x1xf32> to vector<4x8x1xf32>
    %51 = arith.mulf %48, %50 : vector<4x8x1xf32>
    %52 = vector.extract_strided_slice %12 {offsets = [0, 5], sizes = [4, 1], strides = [1, 1]} : vector<4x6xf32> to vector<4x1xf32>
    %53 = vector.shape_cast %52 : vector<4x1xf32> to vector<4x1x1xf32>
    %54 = vector.broadcast %53 : vector<4x1x1xf32> to vector<4x8x1xf32>
    %55 = arith.addf %51, %54 : vector<4x8x1xf32>
    %56 = vector.extract_strided_slice %47 {offsets = [0, 0, 0], sizes = [1, 8, 1], strides = [1, 1, 1]} : vector<4x8x5xf32> to vector<1x8x1xf32>
    %57 = vector.shape_cast %56 : vector<1x8x1xf32> to vector<8x1xf32>
    %58 = vector.extract_strided_slice %3 {offsets = [0, 0, 0], sizes = [1, 8, 32], strides = [1, 1, 1]} : vector<4x8x32xf32> to vector<1x8x32xf32>
    %59 = vector.shape_cast %58 : vector<1x8x32xf32> to vector<8x32xf32>
    %60 = vector.broadcast %57 : vector<8x1xf32> to vector<8x32xf32>
    %61 = arith.mulf %60, %59 : vector<8x32xf32>
    %62 = vector.extract_strided_slice %47 {offsets = [1, 0, 0], sizes = [1, 8, 1], strides = [1, 1, 1]} : vector<4x8x5xf32> to vector<1x8x1xf32>
    %63 = vector.shape_cast %62 : vector<1x8x1xf32> to vector<8x1xf32>
    %64 = vector.extract_strided_slice %3 {offsets = [1, 0, 0], sizes = [1, 8, 32], strides = [1, 1, 1]} : vector<4x8x32xf32> to vector<1x8x32xf32>
    %65 = vector.shape_cast %64 : vector<1x8x32xf32> to vector<8x32xf32>
    %66 = vector.broadcast %63 : vector<8x1xf32> to vector<8x32xf32>
    %67 = arith.mulf %66, %65 : vector<8x32xf32>
    %68 = arith.addf %61, %67 : vector<8x32xf32>
    %69 = vector.extract_strided_slice %47 {offsets = [2, 0, 0], sizes = [1, 8, 1], strides = [1, 1, 1]} : vector<4x8x5xf32> to vector<1x8x1xf32>
    %70 = vector.shape_cast %69 : vector<1x8x1xf32> to vector<8x1xf32>
    %71 = vector.extract_strided_slice %3 {offsets = [2, 0, 0], sizes = [1, 8, 32], strides = [1, 1, 1]} : vector<4x8x32xf32> to vector<1x8x32xf32>
    %72 = vector.shape_cast %71 : vector<1x8x32xf32> to vector<8x32xf32>
    %73 = vector.broadcast %70 : vector<8x1xf32> to vector<8x32xf32>
    %74 = arith.mulf %73, %72 : vector<8x32xf32>
    %75 = arith.addf %68, %74 : vector<8x32xf32>
    %76 = vector.extract_strided_slice %47 {offsets = [3, 0, 0], sizes = [1, 8, 1], strides = [1, 1, 1]} : vector<4x8x5xf32> to vector<1x8x1xf32>
    %77 = vector.shape_cast %76 : vector<1x8x1xf32> to vector<8x1xf32>
    %78 = vector.extract_strided_slice %3 {offsets = [3, 0, 0], sizes = [1, 8, 32], strides = [1, 1, 1]} : vector<4x8x32xf32> to vector<1x8x32xf32>
    %79 = vector.shape_cast %78 : vector<1x8x32xf32> to vector<8x32xf32>
    %80 = vector.broadcast %77 : vector<8x1xf32> to vector<8x32xf32>
    %81 = arith.mulf %80, %79 : vector<8x32xf32>
    %82 = arith.addf %75, %81 : vector<8x32xf32>
    %83 = vector.extract_strided_slice %47 {offsets = [0, 0, 1], sizes = [1, 8, 1], strides = [1, 1, 1]} : vector<4x8x5xf32> to vector<1x8x1xf32>
    %84 = vector.shape_cast %83 : vector<1x8x1xf32> to vector<8x1xf32>
    %85 = vector.extract_strided_slice %3 {offsets = [0, 0, 0], sizes = [1, 8, 32], strides = [1, 1, 1]} : vector<4x8x32xf32> to vector<1x8x32xf32>
    %86 = vector.shape_cast %85 : vector<1x8x32xf32> to vector<8x32xf32>
    %87 = vector.broadcast %84 : vector<8x1xf32> to vector<8x32xf32>
    %88 = arith.mulf %87, %86 : vector<8x32xf32>
    %89 = vector.extract_strided_slice %47 {offsets = [1, 0, 1], sizes = [1, 8, 1], strides = [1, 1, 1]} : vector<4x8x5xf32> to vector<1x8x1xf32>
    %90 = vector.shape_cast %89 : vector<1x8x1xf32> to vector<8x1xf32>
    %91 = vector.extract_strided_slice %3 {offsets = [1, 0, 0], sizes = [1, 8, 32], strides = [1, 1, 1]} : vector<4x8x32xf32> to vector<1x8x32xf32>
    %92 = vector.shape_cast %91 : vector<1x8x32xf32> to vector<8x32xf32>
    %93 = vector.broadcast %90 : vector<8x1xf32> to vector<8x32xf32>
    %94 = arith.mulf %93, %92 : vector<8x32xf32>
    %95 = arith.addf %88, %94 : vector<8x32xf32>
    %96 = vector.extract_strided_slice %47 {offsets = [2, 0, 1], sizes = [1, 8, 1], strides = [1, 1, 1]} : vector<4x8x5xf32> to vector<1x8x1xf32>
    %97 = vector.shape_cast %96 : vector<1x8x1xf32> to vector<8x1xf32>
    %98 = vector.extract_strided_slice %3 {offsets = [2, 0, 0], sizes = [1, 8, 32], strides = [1, 1, 1]} : vector<4x8x32xf32> to vector<1x8x32xf32>
    %99 = vector.shape_cast %98 : vector<1x8x32xf32> to vector<8x32xf32>
    %100 = vector.broadcast %97 : vector<8x1xf32> to vector<8x32xf32>
    %101 = arith.mulf %100, %99 : vector<8x32xf32>
    %102 = arith.addf %95, %101 : vector<8x32xf32>
    %103 = vector.extract_strided_slice %47 {offsets = [3, 0, 1], sizes = [1, 8, 1], strides = [1, 1, 1]} : vector<4x8x5xf32> to vector<1x8x1xf32>
    %104 = vector.shape_cast %103 : vector<1x8x1xf32> to vector<8x1xf32>
    %105 = vector.extract_strided_slice %3 {offsets = [3, 0, 0], sizes = [1, 8, 32], strides = [1, 1, 1]} : vector<4x8x32xf32> to vector<1x8x32xf32>
    %106 = vector.shape_cast %105 : vector<1x8x32xf32> to vector<8x32xf32>
    %107 = vector.broadcast %104 : vector<8x1xf32> to vector<8x32xf32>
    %108 = arith.mulf %107, %106 : vector<8x32xf32>
    %109 = arith.addf %102, %108 : vector<8x32xf32>
    %110 = vector.extract_strided_slice %47 {offsets = [0, 0, 2], sizes = [1, 8, 1], strides = [1, 1, 1]} : vector<4x8x5xf32> to vector<1x8x1xf32>
    %111 = vector.shape_cast %110 : vector<1x8x1xf32> to vector<8x1xf32>
    %112 = vector.extract_strided_slice %3 {offsets = [0, 0, 0], sizes = [1, 8, 32], strides = [1, 1, 1]} : vector<4x8x32xf32> to vector<1x8x32xf32>
    %113 = vector.shape_cast %112 : vector<1x8x32xf32> to vector<8x32xf32>
    %114 = vector.broadcast %111 : vector<8x1xf32> to vector<8x32xf32>
    %115 = arith.mulf %114, %113 : vector<8x32xf32>
    %116 = vector.extract_strided_slice %47 {offsets = [1, 0, 2], sizes = [1, 8, 1], strides = [1, 1, 1]} : vector<4x8x5xf32> to vector<1x8x1xf32>
    %117 = vector.shape_cast %116 : vector<1x8x1xf32> to vector<8x1xf32>
    %118 = vector.extract_strided_slice %3 {offsets = [1, 0, 0], sizes = [1, 8, 32], strides = [1, 1, 1]} : vector<4x8x32xf32> to vector<1x8x32xf32>
    %119 = vector.shape_cast %118 : vector<1x8x32xf32> to vector<8x32xf32>
    %120 = vector.broadcast %117 : vector<8x1xf32> to vector<8x32xf32>
    %121 = arith.mulf %120, %119 : vector<8x32xf32>
    %122 = arith.addf %115, %121 : vector<8x32xf32>
    %123 = vector.extract_strided_slice %47 {offsets = [2, 0, 2], sizes = [1, 8, 1], strides = [1, 1, 1]} : vector<4x8x5xf32> to vector<1x8x1xf32>
    %124 = vector.shape_cast %123 : vector<1x8x1xf32> to vector<8x1xf32>
    %125 = vector.extract_strided_slice %3 {offsets = [2, 0, 0], sizes = [1, 8, 32], strides = [1, 1, 1]} : vector<4x8x32xf32> to vector<1x8x32xf32>
    %126 = vector.shape_cast %125 : vector<1x8x32xf32> to vector<8x32xf32>
    %127 = vector.broadcast %124 : vector<8x1xf32> to vector<8x32xf32>
    %128 = arith.mulf %127, %126 : vector<8x32xf32>
    %129 = arith.addf %122, %128 : vector<8x32xf32>
    %130 = vector.extract_strided_slice %47 {offsets = [3, 0, 2], sizes = [1, 8, 1], strides = [1, 1, 1]} : vector<4x8x5xf32> to vector<1x8x1xf32>
    %131 = vector.shape_cast %130 : vector<1x8x1xf32> to vector<8x1xf32>
    %132 = vector.extract_strided_slice %3 {offsets = [3, 0, 0], sizes = [1, 8, 32], strides = [1, 1, 1]} : vector<4x8x32xf32> to vector<1x8x32xf32>
    %133 = vector.shape_cast %132 : vector<1x8x32xf32> to vector<8x32xf32>
    %134 = vector.broadcast %131 : vector<8x1xf32> to vector<8x32xf32>
    %135 = arith.mulf %134, %133 : vector<8x32xf32>
    %136 = arith.addf %129, %135 : vector<8x32xf32>
    %137 = vector.extract_strided_slice %47 {offsets = [0, 0, 3], sizes = [1, 8, 1], strides = [1, 1, 1]} : vector<4x8x5xf32> to vector<1x8x1xf32>
    %138 = vector.shape_cast %137 : vector<1x8x1xf32> to vector<8x1xf32>
    %139 = vector.extract_strided_slice %3 {offsets = [0, 0, 0], sizes = [1, 8, 32], strides = [1, 1, 1]} : vector<4x8x32xf32> to vector<1x8x32xf32>
    %140 = vector.shape_cast %139 : vector<1x8x32xf32> to vector<8x32xf32>
    %141 = vector.broadcast %138 : vector<8x1xf32> to vector<8x32xf32>
    %142 = arith.mulf %141, %140 : vector<8x32xf32>
    %143 = vector.extract_strided_slice %47 {offsets = [1, 0, 3], sizes = [1, 8, 1], strides = [1, 1, 1]} : vector<4x8x5xf32> to vector<1x8x1xf32>
    %144 = vector.shape_cast %143 : vector<1x8x1xf32> to vector<8x1xf32>
    %145 = vector.extract_strided_slice %3 {offsets = [1, 0, 0], sizes = [1, 8, 32], strides = [1, 1, 1]} : vector<4x8x32xf32> to vector<1x8x32xf32>
    %146 = vector.shape_cast %145 : vector<1x8x32xf32> to vector<8x32xf32>
    %147 = vector.broadcast %144 : vector<8x1xf32> to vector<8x32xf32>
    %148 = arith.mulf %147, %146 : vector<8x32xf32>
    %149 = arith.addf %142, %148 : vector<8x32xf32>
    %150 = vector.extract_strided_slice %47 {offsets = [2, 0, 3], sizes = [1, 8, 1], strides = [1, 1, 1]} : vector<4x8x5xf32> to vector<1x8x1xf32>
    %151 = vector.shape_cast %150 : vector<1x8x1xf32> to vector<8x1xf32>
    %152 = vector.extract_strided_slice %3 {offsets = [2, 0, 0], sizes = [1, 8, 32], strides = [1, 1, 1]} : vector<4x8x32xf32> to vector<1x8x32xf32>
    %153 = vector.shape_cast %152 : vector<1x8x32xf32> to vector<8x32xf32>
    %154 = vector.broadcast %151 : vector<8x1xf32> to vector<8x32xf32>
    %155 = arith.mulf %154, %153 : vector<8x32xf32>
    %156 = arith.addf %149, %155 : vector<8x32xf32>
    %157 = vector.extract_strided_slice %47 {offsets = [3, 0, 3], sizes = [1, 8, 1], strides = [1, 1, 1]} : vector<4x8x5xf32> to vector<1x8x1xf32>
    %158 = vector.shape_cast %157 : vector<1x8x1xf32> to vector<8x1xf32>
    %159 = vector.extract_strided_slice %3 {offsets = [3, 0, 0], sizes = [1, 8, 32], strides = [1, 1, 1]} : vector<4x8x32xf32> to vector<1x8x32xf32>
    %160 = vector.shape_cast %159 : vector<1x8x32xf32> to vector<8x32xf32>
    %161 = vector.broadcast %158 : vector<8x1xf32> to vector<8x32xf32>
    %162 = arith.mulf %161, %160 : vector<8x32xf32>
    %163 = arith.addf %156, %162 : vector<8x32xf32>
    %164 = vector.extract_strided_slice %47 {offsets = [0, 0, 4], sizes = [1, 8, 1], strides = [1, 1, 1]} : vector<4x8x5xf32> to vector<1x8x1xf32>
    %165 = vector.shape_cast %164 : vector<1x8x1xf32> to vector<8x1xf32>
    %166 = vector.extract_strided_slice %3 {offsets = [0, 0, 0], sizes = [1, 8, 32], strides = [1, 1, 1]} : vector<4x8x32xf32> to vector<1x8x32xf32>
    %167 = vector.shape_cast %166 : vector<1x8x32xf32> to vector<8x32xf32>
    %168 = vector.broadcast %165 : vector<8x1xf32> to vector<8x32xf32>
    %169 = arith.mulf %168, %167 : vector<8x32xf32>
    %170 = vector.extract_strided_slice %47 {offsets = [1, 0, 4], sizes = [1, 8, 1], strides = [1, 1, 1]} : vector<4x8x5xf32> to vector<1x8x1xf32>
    %171 = vector.shape_cast %170 : vector<1x8x1xf32> to vector<8x1xf32>
    %172 = vector.extract_strided_slice %3 {offsets = [1, 0, 0], sizes = [1, 8, 32], strides = [1, 1, 1]} : vector<4x8x32xf32> to vector<1x8x32xf32>
    %173 = vector.shape_cast %172 : vector<1x8x32xf32> to vector<8x32xf32>
    %174 = vector.broadcast %171 : vector<8x1xf32> to vector<8x32xf32>
    %175 = arith.mulf %174, %173 : vector<8x32xf32>
    %176 = arith.addf %169, %175 : vector<8x32xf32>
    %177 = vector.extract_strided_slice %47 {offsets = [2, 0, 4], sizes = [1, 8, 1], strides = [1, 1, 1]} : vector<4x8x5xf32> to vector<1x8x1xf32>
    %178 = vector.shape_cast %177 : vector<1x8x1xf32> to vector<8x1xf32>
    %179 = vector.extract_strided_slice %3 {offsets = [2, 0, 0], sizes = [1, 8, 32], strides = [1, 1, 1]} : vector<4x8x32xf32> to vector<1x8x32xf32>
    %180 = vector.shape_cast %179 : vector<1x8x32xf32> to vector<8x32xf32>
    %181 = vector.broadcast %178 : vector<8x1xf32> to vector<8x32xf32>
    %182 = arith.mulf %181, %180 : vector<8x32xf32>
    %183 = arith.addf %176, %182 : vector<8x32xf32>
    %184 = vector.extract_strided_slice %47 {offsets = [3, 0, 4], sizes = [1, 8, 1], strides = [1, 1, 1]} : vector<4x8x5xf32> to vector<1x8x1xf32>
    %185 = vector.shape_cast %184 : vector<1x8x1xf32> to vector<8x1xf32>
    %186 = vector.extract_strided_slice %3 {offsets = [3, 0, 0], sizes = [1, 8, 32], strides = [1, 1, 1]} : vector<4x8x32xf32> to vector<1x8x32xf32>
    %187 = vector.shape_cast %186 : vector<1x8x32xf32> to vector<8x32xf32>
    %188 = vector.broadcast %185 : vector<8x1xf32> to vector<8x32xf32>
    %189 = arith.mulf %188, %187 : vector<8x32xf32>
    %190 = arith.addf %183, %189 : vector<8x32xf32>
    %191 = vector.shape_cast %109 : vector<8x32xf32> to vector<1x8x32xf32>
    %192 = vector.shape_cast %136 : vector<8x32xf32> to vector<1x8x32xf32>
    %193 = vector.shape_cast %163 : vector<8x32xf32> to vector<1x8x32xf32>
    %194 = vector.shape_cast %190 : vector<8x32xf32> to vector<1x8x32xf32>
    %195 = tpu.concatenate %191, %192, %193, %194 in 0 : vector<1x8x32xf32>, vector<1x8x32xf32>, vector<1x8x32xf32>, vector<1x8x32xf32> -> vector<4x8x32xf32>
    %196 = vector.extract_strided_slice %5 {offsets = [2, 0], sizes = [2, 32], strides = [1, 1]} : vector<24x128xf32> to vector<2x32xf32>
    %197 = vector.extract_strided_slice %196 {offsets = [0, 0], sizes = [1, 32], strides = [1, 1]} : vector<2x32xf32> to vector<1x32xf32>
    %198 = vector.shape_cast %197 : vector<1x32xf32> to vector<32xf32>
    %199 = vector.extract_strided_slice %196 {offsets = [1, 0], sizes = [1, 32], strides = [1, 1]} : vector<2x32xf32> to vector<1x32xf32>
    %200 = vector.shape_cast %199 : vector<1x32xf32> to vector<32xf32>
    %c0_14 = arith.constant 0 : index
    %c0_15 = arith.constant 0 : index
    %c0_16 = arith.constant 0 : index
    %201 = vector.load %arg5[%c0_14, %c0_15, %c0_16] : memref<1x32x192xf32, #tpu.memory_space<vmem>>, vector<1x32x192xf32>
    %202 = vector.shape_cast %201 : vector<1x32x192xf32> to vector<32x192xf32>
    %c0_17 = arith.constant 0 : index
    %c0_18 = arith.constant 0 : index
    %c0_19 = arith.constant 0 : index
    %203 = vector.load %arg6[%c0_17, %c0_18, %c0_19] : memref<1x64x32xf32, #tpu.memory_space<vmem>>, vector<1x64x32xf32>
    %204 = vector.shape_cast %203 : vector<1x64x32xf32> to vector<64x32xf32>
    %cst_20 = arith.constant dense<0.000000e+00> : vector<8xf32>
    %205 = vector.multi_reduction <add>, %82, %cst_20 [1] : vector<8x32xf32> to vector<8xf32>
    %206 = vector.shape_cast %205 : vector<8xf32> to vector<8x1xf32>
    %cst_21 = arith.constant 3.200000e+01 : f32
    %207 = vector.broadcast %cst_21 : f32 to vector<8x1xf32>
    %208 = arith.divf %206, %207 : vector<8x1xf32>
    %209 = vector.broadcast %208 : vector<8x1xf32> to vector<8x32xf32>
    %210 = arith.subf %82, %209 : vector<8x32xf32>
    %211 = arith.mulf %210, %210 : vector<8x32xf32>
    %cst_22 = arith.constant dense<0.000000e+00> : vector<8xf32>
    %212 = vector.multi_reduction <add>, %211, %cst_22 [1] : vector<8x32xf32> to vector<8xf32>
    %213 = vector.shape_cast %212 : vector<8xf32> to vector<8x1xf32>
    %cst_23 = arith.constant 3.200000e+01 : f32
    %214 = vector.broadcast %cst_23 : f32 to vector<8x1xf32>
    %215 = arith.divf %213, %214 : vector<8x1xf32>
    %216 = vector.broadcast %208 : vector<8x1xf32> to vector<8x32xf32>
    %217 = arith.subf %82, %216 : vector<8x32xf32>
    %cst_24 = arith.constant 9.99999974E-6 : f32
    %218 = vector.broadcast %cst_24 : f32 to vector<8x1xf32>
    %219 = arith.addf %215, %218 : vector<8x1xf32>
    %220 = math.rsqrt %219 : vector<8x1xf32>
    %221 = vector.broadcast %220 : vector<8x1xf32> to vector<8x32xf32>
    %222 = arith.mulf %217, %221 : vector<8x32xf32>
    %223 = vector.shape_cast %198 : vector<32xf32> to vector<1x32xf32>
    %224 = vector.broadcast %223 : vector<1x32xf32> to vector<8x32xf32>
    %225 = arith.mulf %222, %224 : vector<8x32xf32>
    %226 = vector.shape_cast %200 : vector<32xf32> to vector<1x32xf32>
    %227 = vector.broadcast %226 : vector<1x32xf32> to vector<8x32xf32>
    %228 = arith.addf %225, %227 : vector<8x32xf32>
    %cst_25 = arith.constant dense<0.000000e+00> : vector<8x192xf32>
    %229 = tpu.matmul %228, %202, %cst_25 {dimension_numbers = #tpu.dot_dimension_numbers<[1], [0], [0], [1], [0, 0, 1, 1], [], []>} : vector<8x32xf32>, vector<32x192xf32>, vector<8x192xf32> -> vector<8x192xf32>
    %230 = vector.extract_strided_slice %229 {offsets = [0, 0], sizes = [8, 64], strides = [1, 1]} : vector<8x192xf32> to vector<8x64xf32>
    %231 = vector.extract_strided_slice %230 {offsets = [0, 0], sizes = [8, 16], strides = [1, 1]} : vector<8x64xf32> to vector<8x16xf32>
    %232 = vector.extract_strided_slice %230 {offsets = [0, 16], sizes = [8, 16], strides = [1, 1]} : vector<8x64xf32> to vector<8x16xf32>
    %233 = vector.extract_strided_slice %230 {offsets = [0, 32], sizes = [8, 16], strides = [1, 1]} : vector<8x64xf32> to vector<8x16xf32>
    %234 = vector.extract_strided_slice %230 {offsets = [0, 48], sizes = [8, 16], strides = [1, 1]} : vector<8x64xf32> to vector<8x16xf32>
    %235 = vector.shape_cast %231 : vector<8x16xf32> to vector<1x8x16xf32>
    %236 = vector.shape_cast %232 : vector<8x16xf32> to vector<1x8x16xf32>
    %237 = vector.shape_cast %233 : vector<8x16xf32> to vector<1x8x16xf32>
    %238 = vector.shape_cast %234 : vector<8x16xf32> to vector<1x8x16xf32>
    %239 = tpu.concatenate %235, %236, %237, %238 in 0 : vector<1x8x16xf32>, vector<1x8x16xf32>, vector<1x8x16xf32>, vector<1x8x16xf32> -> vector<4x8x16xf32>
    %240 = vector.extract_strided_slice %229 {offsets = [0, 64], sizes = [8, 64], strides = [1, 1]} : vector<8x192xf32> to vector<8x64xf32>
    %241 = vector.extract_strided_slice %240 {offsets = [0, 0], sizes = [8, 16], strides = [1, 1]} : vector<8x64xf32> to vector<8x16xf32>
    %242 = vector.extract_strided_slice %240 {offsets = [0, 16], sizes = [8, 16], strides = [1, 1]} : vector<8x64xf32> to vector<8x16xf32>
    %243 = vector.extract_strided_slice %240 {offsets = [0, 32], sizes = [8, 16], strides = [1, 1]} : vector<8x64xf32> to vector<8x16xf32>
    %244 = vector.extract_strided_slice %240 {offsets = [0, 48], sizes = [8, 16], strides = [1, 1]} : vector<8x64xf32> to vector<8x16xf32>
    %245 = vector.shape_cast %241 : vector<8x16xf32> to vector<1x8x16xf32>
    %246 = vector.shape_cast %242 : vector<8x16xf32> to vector<1x8x16xf32>
    %247 = vector.shape_cast %243 : vector<8x16xf32> to vector<1x8x16xf32>
    %248 = vector.shape_cast %244 : vector<8x16xf32> to vector<1x8x16xf32>
    %249 = tpu.concatenate %245, %246, %247, %248 in 0 : vector<1x8x16xf32>, vector<1x8x16xf32>, vector<1x8x16xf32>, vector<1x8x16xf32> -> vector<4x8x16xf32>
    %250 = vector.extract_strided_slice %229 {offsets = [0, 128], sizes = [8, 64], strides = [1, 1]} : vector<8x192xf32> to vector<8x64xf32>
    %251 = vector.extract_strided_slice %250 {offsets = [0, 0], sizes = [8, 16], strides = [1, 1]} : vector<8x64xf32> to vector<8x16xf32>
    %252 = vector.extract_strided_slice %250 {offsets = [0, 16], sizes = [8, 16], strides = [1, 1]} : vector<8x64xf32> to vector<8x16xf32>
    %253 = vector.extract_strided_slice %250 {offsets = [0, 32], sizes = [8, 16], strides = [1, 1]} : vector<8x64xf32> to vector<8x16xf32>
    %254 = vector.extract_strided_slice %250 {offsets = [0, 48], sizes = [8, 16], strides = [1, 1]} : vector<8x64xf32> to vector<8x16xf32>
    %255 = vector.shape_cast %251 : vector<8x16xf32> to vector<1x8x16xf32>
    %256 = vector.shape_cast %252 : vector<8x16xf32> to vector<1x8x16xf32>
    %257 = vector.shape_cast %253 : vector<8x16xf32> to vector<1x8x16xf32>
    %258 = vector.shape_cast %254 : vector<8x16xf32> to vector<1x8x16xf32>
    %259 = tpu.concatenate %255, %256, %257, %258 in 0 : vector<1x8x16xf32>, vector<1x8x16xf32>, vector<1x8x16xf32>, vector<1x8x16xf32> -> vector<4x8x16xf32>
    "tpu.trace_start"() <{level = 10 : i32, message = "bqd,bkd->bqk"}> : () -> ()
    %cst_26 = arith.constant dense<0.000000e+00> : vector<4x8x8xf32>
    %260 = tpu.matmul %239, %249, %cst_26 {dimension_numbers = #tpu.dot_dimension_numbers<[2], [2], [1], [1], [0, 0, 0, 1, 1, 1], [0], [0]>} : vector<4x8x16xf32>, vector<4x8x16xf32>, vector<4x8x8xf32> -> vector<4x8x8xf32>
    "tpu.trace_stop"() : () -> ()
    %cst_27 = arith.constant 2.500000e-01 : f32
    %261 = vector.broadcast %cst_27 : f32 to vector<4x8x8xf32>
    %262 = arith.mulf %260, %261 : vector<4x8x8xf32>
    %cst_28 = arith.constant dense<0xFF800000> : vector<4x8xf32>
    %263 = vector.multi_reduction <maximumf>, %262, %cst_28 [2] : vector<4x8x8xf32> to vector<4x8xf32>
    %264 = vector.shape_cast %263 : vector<4x8xf32> to vector<4x8x1xf32>
    %265 = vector.broadcast %264 : vector<4x8x1xf32> to vector<4x8x8xf32>
    %266 = arith.subf %262, %265 : vector<4x8x8xf32>
    %267 = math.exp %266 : vector<4x8x8xf32>
    %cst_29 = arith.constant dense<0.000000e+00> : vector<4x8xf32>
    %268 = vector.multi_reduction <add>, %267, %cst_29 [2] : vector<4x8x8xf32> to vector<4x8xf32>
    %269 = vector.shape_cast %268 : vector<4x8xf32> to vector<4x8x1xf32>
    %270 = vector.broadcast %269 : vector<4x8x1xf32> to vector<4x8x8xf32>
    %271 = arith.divf %267, %270 : vector<4x8x8xf32>
    "tpu.trace_start"() <{level = 10 : i32, message = "bqk,bkd->bqd"}> : () -> ()
    %cst_30 = arith.constant dense<0.000000e+00> : vector<4x8x16xf32>
    %272 = tpu.matmul %271, %259, %cst_30 {dimension_numbers = #tpu.dot_dimension_numbers<[2], [1], [1], [2], [0, 0, 0, 1, 1, 2], [0], [0]>} : vector<4x8x8xf32>, vector<4x8x16xf32>, vector<4x8x16xf32> -> vector<4x8x16xf32>
    "tpu.trace_stop"() : () -> ()
    %273 = vector.extract_strided_slice %272 {offsets = [0, 0, 0], sizes = [1, 8, 16], strides = [1, 1, 1]} : vector<4x8x16xf32> to vector<1x8x16xf32>
    %274 = vector.shape_cast %273 : vector<1x8x16xf32> to vector<8x16xf32>
    %275 = vector.extract_strided_slice %272 {offsets = [1, 0, 0], sizes = [1, 8, 16], strides = [1, 1, 1]} : vector<4x8x16xf32> to vector<1x8x16xf32>
    %276 = vector.shape_cast %275 : vector<1x8x16xf32> to vector<8x16xf32>
    %277 = vector.extract_strided_slice %272 {offsets = [2, 0, 0], sizes = [1, 8, 16], strides = [1, 1, 1]} : vector<4x8x16xf32> to vector<1x8x16xf32>
    %278 = vector.shape_cast %277 : vector<1x8x16xf32> to vector<8x16xf32>
    %279 = vector.extract_strided_slice %272 {offsets = [3, 0, 0], sizes = [1, 8, 16], strides = [1, 1, 1]} : vector<4x8x16xf32> to vector<1x8x16xf32>
    %280 = vector.shape_cast %279 : vector<1x8x16xf32> to vector<8x16xf32>
    %281 = tpu.concatenate %274, %276, %278, %280 in 1 : vector<8x16xf32>, vector<8x16xf32>, vector<8x16xf32>, vector<8x16xf32> -> vector<8x64xf32>
    %cst_31 = arith.constant dense<0.000000e+00> : vector<8x32xf32>
    %282 = tpu.matmul %281, %204, %cst_31 {dimension_numbers = #tpu.dot_dimension_numbers<[1], [0], [0], [1], [0, 0, 1, 1], [], []>} : vector<8x64xf32>, vector<64x32xf32>, vector<8x32xf32> -> vector<8x32xf32>
    %283 = vector.shape_cast %282 : vector<8x32xf32> to vector<1x8x32xf32>
    %284 = vector.broadcast %55 : vector<4x8x1xf32> to vector<4x8x32xf32>
    %285 = vector.broadcast %283 : vector<1x8x32xf32> to vector<4x8x32xf32>
    %286 = arith.mulf %284, %285 : vector<4x8x32xf32>
    %287 = arith.addf %195, %286 : vector<4x8x32xf32>
    %288 = vector.extract_strided_slice %5 {offsets = [1, 0], sizes = [1, 32], strides = [1, 1]} : vector<24x128xf32> to vector<1x32xf32>
    %289 = vector.shape_cast %288 : vector<1x32xf32> to vector<32xf32>
    %290 = vector.extract_strided_slice %5 {offsets = [12, 0], sizes = [4, 6], strides = [1, 1]} : vector<24x128xf32> to vector<4x6xf32>
    %291 = vector.extract_strided_slice %9 {offsets = [2], sizes = [1], strides = [1]} : vector<4xf32> to vector<1xf32>
    %292 = vector.extract_strided_slice %9 {offsets = [3], sizes = [1], strides = [1]} : vector<4xf32> to vector<1xf32>
    %cst_32 = arith.constant dense<0.000000e+00> : vector<4x8xf32>
    %293 = vector.multi_reduction <add>, %287, %cst_32 [2] : vector<4x8x32xf32> to vector<4x8xf32>
    %294 = vector.shape_cast %293 : vector<4x8xf32> to vector<4x8x1xf32>
    %cst_33 = arith.constant 3.200000e+01 : f32
    %295 = vector.broadcast %cst_33 : f32 to vector<4x8x1xf32>
    %296 = arith.divf %294, %295 : vector<4x8x1xf32>
    %297 = vector.broadcast %296 : vector<4x8x1xf32> to vector<4x8x32xf32>
    %298 = arith.subf %287, %297 : vector<4x8x32xf32>
    %299 = arith.mulf %298, %298 : vector<4x8x32xf32>
    %cst_34 = arith.constant dense<0.000000e+00> : vector<4x8xf32>
    %300 = vector.multi_reduction <add>, %299, %cst_34 [2] : vector<4x8x32xf32> to vector<4x8xf32>
    %301 = vector.shape_cast %300 : vector<4x8xf32> to vector<4x8x1xf32>
    %cst_35 = arith.constant 3.200000e+01 : f32
    %302 = vector.broadcast %cst_35 : f32 to vector<4x8x1xf32>
    %303 = arith.divf %301, %302 : vector<4x8x1xf32>
    %304 = vector.broadcast %296 : vector<4x8x1xf32> to vector<4x8x32xf32>
    %305 = arith.subf %287, %304 : vector<4x8x32xf32>
    %cst_36 = arith.constant 9.99999974E-6 : f32
    %306 = vector.broadcast %cst_36 : f32 to vector<4x8x1xf32>
    %307 = arith.addf %303, %306 : vector<4x8x1xf32>
    %308 = math.rsqrt %307 : vector<4x8x1xf32>
    %309 = vector.broadcast %308 : vector<4x8x1xf32> to vector<4x8x32xf32>
    %310 = arith.mulf %305, %309 : vector<4x8x32xf32>
    %311 = vector.shape_cast %289 : vector<32xf32> to vector<1x1x32xf32>
    %312 = vector.broadcast %311 : vector<1x1x32xf32> to vector<4x8x32xf32>
    %313 = arith.mulf %310, %312 : vector<4x8x32xf32>
    %314 = vector.shape_cast %313 : vector<4x8x32xf32> to vector<32x32xf32>
    %cst_37 = arith.constant dense<0.000000e+00> : vector<32x12xf32>
    %315 = tpu.matmul %314, %7, %cst_37 {dimension_numbers = #tpu.dot_dimension_numbers<[1], [0], [0], [1], [0, 0, 1, 1], [], []>} : vector<32x32xf32>, vector<32x12xf32>, vector<32x12xf32> -> vector<32x12xf32>
    %316 = math.tanh %315 : vector<32x12xf32>
    %317 = vector.shape_cast %316 : vector<32x12xf32> to vector<4x8x12xf32>
    %318 = vector.extract_strided_slice %317 {offsets = [0, 0, 6], sizes = [4, 8, 5], strides = [1, 1, 1]} : vector<4x8x12xf32> to vector<4x8x5xf32>
    %319 = vector.shape_cast %291 : vector<1xf32> to vector<1x1x1xf32>
    %320 = vector.broadcast %319 : vector<1x1x1xf32> to vector<4x8x5xf32>
    %321 = arith.mulf %318, %320 : vector<4x8x5xf32>
    %322 = vector.extract_strided_slice %290 {offsets = [0, 0], sizes = [4, 5], strides = [1, 1]} : vector<4x6xf32> to vector<4x5xf32>
    %323 = vector.shape_cast %322 : vector<4x5xf32> to vector<4x1x5xf32>
    %324 = vector.broadcast %323 : vector<4x1x5xf32> to vector<4x8x5xf32>
    %325 = arith.addf %321, %324 : vector<4x8x5xf32>
    %326 = vector.extract_strided_slice %317 {offsets = [0, 0, 11], sizes = [4, 8, 1], strides = [1, 1, 1]} : vector<4x8x12xf32> to vector<4x8x1xf32>
    %327 = vector.shape_cast %292 : vector<1xf32> to vector<1x1x1xf32>
    %328 = vector.broadcast %327 : vector<1x1x1xf32> to vector<4x8x1xf32>
    %329 = arith.mulf %326, %328 : vector<4x8x1xf32>
    %330 = vector.extract_strided_slice %290 {offsets = [0, 5], sizes = [4, 1], strides = [1, 1]} : vector<4x6xf32> to vector<4x1xf32>
    %331 = vector.shape_cast %330 : vector<4x1xf32> to vector<4x1x1xf32>
    %332 = vector.broadcast %331 : vector<4x1x1xf32> to vector<4x8x1xf32>
    %333 = arith.addf %329, %332 : vector<4x8x1xf32>
    %334 = vector.extract_strided_slice %325 {offsets = [0, 0, 0], sizes = [1, 8, 1], strides = [1, 1, 1]} : vector<4x8x5xf32> to vector<1x8x1xf32>
    %335 = vector.shape_cast %334 : vector<1x8x1xf32> to vector<8x1xf32>
    %336 = vector.extract_strided_slice %287 {offsets = [0, 0, 0], sizes = [1, 8, 32], strides = [1, 1, 1]} : vector<4x8x32xf32> to vector<1x8x32xf32>
    %337 = vector.shape_cast %336 : vector<1x8x32xf32> to vector<8x32xf32>
    %338 = vector.broadcast %335 : vector<8x1xf32> to vector<8x32xf32>
    %339 = arith.mulf %338, %337 : vector<8x32xf32>
    %340 = vector.extract_strided_slice %325 {offsets = [1, 0, 0], sizes = [1, 8, 1], strides = [1, 1, 1]} : vector<4x8x5xf32> to vector<1x8x1xf32>
    %341 = vector.shape_cast %340 : vector<1x8x1xf32> to vector<8x1xf32>
    %342 = vector.extract_strided_slice %287 {offsets = [1, 0, 0], sizes = [1, 8, 32], strides = [1, 1, 1]} : vector<4x8x32xf32> to vector<1x8x32xf32>
    %343 = vector.shape_cast %342 : vector<1x8x32xf32> to vector<8x32xf32>
    %344 = vector.broadcast %341 : vector<8x1xf32> to vector<8x32xf32>
    %345 = arith.mulf %344, %343 : vector<8x32xf32>
    %346 = arith.addf %339, %345 : vector<8x32xf32>
    %347 = vector.extract_strided_slice %325 {offsets = [2, 0, 0], sizes = [1, 8, 1], strides = [1, 1, 1]} : vector<4x8x5xf32> to vector<1x8x1xf32>
    %348 = vector.shape_cast %347 : vector<1x8x1xf32> to vector<8x1xf32>
    %349 = vector.extract_strided_slice %287 {offsets = [2, 0, 0], sizes = [1, 8, 32], strides = [1, 1, 1]} : vector<4x8x32xf32> to vector<1x8x32xf32>
    %350 = vector.shape_cast %349 : vector<1x8x32xf32> to vector<8x32xf32>
    %351 = vector.broadcast %348 : vector<8x1xf32> to vector<8x32xf32>
    %352 = arith.mulf %351, %350 : vector<8x32xf32>
    %353 = arith.addf %346, %352 : vector<8x32xf32>
    %354 = vector.extract_strided_slice %325 {offsets = [3, 0, 0], sizes = [1, 8, 1], strides = [1, 1, 1]} : vector<4x8x5xf32> to vector<1x8x1xf32>
    %355 = vector.shape_cast %354 : vector<1x8x1xf32> to vector<8x1xf32>
    %356 = vector.extract_strided_slice %287 {offsets = [3, 0, 0], sizes = [1, 8, 32], strides = [1, 1, 1]} : vector<4x8x32xf32> to vector<1x8x32xf32>
    %357 = vector.shape_cast %356 : vector<1x8x32xf32> to vector<8x32xf32>
    %358 = vector.broadcast %355 : vector<8x1xf32> to vector<8x32xf32>
    %359 = arith.mulf %358, %357 : vector<8x32xf32>
    %360 = arith.addf %353, %359 : vector<8x32xf32>
    %361 = vector.extract_strided_slice %325 {offsets = [0, 0, 1], sizes = [1, 8, 1], strides = [1, 1, 1]} : vector<4x8x5xf32> to vector<1x8x1xf32>
    %362 = vector.shape_cast %361 : vector<1x8x1xf32> to vector<8x1xf32>
    %363 = vector.extract_strided_slice %287 {offsets = [0, 0, 0], sizes = [1, 8, 32], strides = [1, 1, 1]} : vector<4x8x32xf32> to vector<1x8x32xf32>
    %364 = vector.shape_cast %363 : vector<1x8x32xf32> to vector<8x32xf32>
    %365 = vector.broadcast %362 : vector<8x1xf32> to vector<8x32xf32>
    %366 = arith.mulf %365, %364 : vector<8x32xf32>
    %367 = vector.extract_strided_slice %325 {offsets = [1, 0, 1], sizes = [1, 8, 1], strides = [1, 1, 1]} : vector<4x8x5xf32> to vector<1x8x1xf32>
    %368 = vector.shape_cast %367 : vector<1x8x1xf32> to vector<8x1xf32>
    %369 = vector.extract_strided_slice %287 {offsets = [1, 0, 0], sizes = [1, 8, 32], strides = [1, 1, 1]} : vector<4x8x32xf32> to vector<1x8x32xf32>
    %370 = vector.shape_cast %369 : vector<1x8x32xf32> to vector<8x32xf32>
    %371 = vector.broadcast %368 : vector<8x1xf32> to vector<8x32xf32>
    %372 = arith.mulf %371, %370 : vector<8x32xf32>
    %373 = arith.addf %366, %372 : vector<8x32xf32>
    %374 = vector.extract_strided_slice %325 {offsets = [2, 0, 1], sizes = [1, 8, 1], strides = [1, 1, 1]} : vector<4x8x5xf32> to vector<1x8x1xf32>
    %375 = vector.shape_cast %374 : vector<1x8x1xf32> to vector<8x1xf32>
    %376 = vector.extract_strided_slice %287 {offsets = [2, 0, 0], sizes = [1, 8, 32], strides = [1, 1, 1]} : vector<4x8x32xf32> to vector<1x8x32xf32>
    %377 = vector.shape_cast %376 : vector<1x8x32xf32> to vector<8x32xf32>
    %378 = vector.broadcast %375 : vector<8x1xf32> to vector<8x32xf32>
    %379 = arith.mulf %378, %377 : vector<8x32xf32>
    %380 = arith.addf %373, %379 : vector<8x32xf32>
    %381 = vector.extract_strided_slice %325 {offsets = [3, 0, 1], sizes = [1, 8, 1], strides = [1, 1, 1]} : vector<4x8x5xf32> to vector<1x8x1xf32>
    %382 = vector.shape_cast %381 : vector<1x8x1xf32> to vector<8x1xf32>
    %383 = vector.extract_strided_slice %287 {offsets = [3, 0, 0], sizes = [1, 8, 32], strides = [1, 1, 1]} : vector<4x8x32xf32> to vector<1x8x32xf32>
    %384 = vector.shape_cast %383 : vector<1x8x32xf32> to vector<8x32xf32>
    %385 = vector.broadcast %382 : vector<8x1xf32> to vector<8x32xf32>
    %386 = arith.mulf %385, %384 : vector<8x32xf32>
    %387 = arith.addf %380, %386 : vector<8x32xf32>
    %388 = vector.extract_strided_slice %325 {offsets = [0, 0, 2], sizes = [1, 8, 1], strides = [1, 1, 1]} : vector<4x8x5xf32> to vector<1x8x1xf32>
    %389 = vector.shape_cast %388 : vector<1x8x1xf32> to vector<8x1xf32>
    %390 = vector.extract_strided_slice %287 {offsets = [0, 0, 0], sizes = [1, 8, 32], strides = [1, 1, 1]} : vector<4x8x32xf32> to vector<1x8x32xf32>
    %391 = vector.shape_cast %390 : vector<1x8x32xf32> to vector<8x32xf32>
    %392 = vector.broadcast %389 : vector<8x1xf32> to vector<8x32xf32>
    %393 = arith.mulf %392, %391 : vector<8x32xf32>
    %394 = vector.extract_strided_slice %325 {offsets = [1, 0, 2], sizes = [1, 8, 1], strides = [1, 1, 1]} : vector<4x8x5xf32> to vector<1x8x1xf32>
    %395 = vector.shape_cast %394 : vector<1x8x1xf32> to vector<8x1xf32>
    %396 = vector.extract_strided_slice %287 {offsets = [1, 0, 0], sizes = [1, 8, 32], strides = [1, 1, 1]} : vector<4x8x32xf32> to vector<1x8x32xf32>
    %397 = vector.shape_cast %396 : vector<1x8x32xf32> to vector<8x32xf32>
    %398 = vector.broadcast %395 : vector<8x1xf32> to vector<8x32xf32>
    %399 = arith.mulf %398, %397 : vector<8x32xf32>
    %400 = arith.addf %393, %399 : vector<8x32xf32>
    %401 = vector.extract_strided_slice %325 {offsets = [2, 0, 2], sizes = [1, 8, 1], strides = [1, 1, 1]} : vector<4x8x5xf32> to vector<1x8x1xf32>
    %402 = vector.shape_cast %401 : vector<1x8x1xf32> to vector<8x1xf32>
    %403 = vector.extract_strided_slice %287 {offsets = [2, 0, 0], sizes = [1, 8, 32], strides = [1, 1, 1]} : vector<4x8x32xf32> to vector<1x8x32xf32>
    %404 = vector.shape_cast %403 : vector<1x8x32xf32> to vector<8x32xf32>
    %405 = vector.broadcast %402 : vector<8x1xf32> to vector<8x32xf32>
    %406 = arith.mulf %405, %404 : vector<8x32xf32>
    %407 = arith.addf %400, %406 : vector<8x32xf32>
    %408 = vector.extract_strided_slice %325 {offsets = [3, 0, 2], sizes = [1, 8, 1], strides = [1, 1, 1]} : vector<4x8x5xf32> to vector<1x8x1xf32>
    %409 = vector.shape_cast %408 : vector<1x8x1xf32> to vector<8x1xf32>
    %410 = vector.extract_strided_slice %287 {offsets = [3, 0, 0], sizes = [1, 8, 32], strides = [1, 1, 1]} : vector<4x8x32xf32> to vector<1x8x32xf32>
    %411 = vector.shape_cast %410 : vector<1x8x32xf32> to vector<8x32xf32>
    %412 = vector.broadcast %409 : vector<8x1xf32> to vector<8x32xf32>
    %413 = arith.mulf %412, %411 : vector<8x32xf32>
    %414 = arith.addf %407, %413 : vector<8x32xf32>
    %415 = vector.extract_strided_slice %325 {offsets = [0, 0, 3], sizes = [1, 8, 1], strides = [1, 1, 1]} : vector<4x8x5xf32> to vector<1x8x1xf32>
    %416 = vector.shape_cast %415 : vector<1x8x1xf32> to vector<8x1xf32>
    %417 = vector.extract_strided_slice %287 {offsets = [0, 0, 0], sizes = [1, 8, 32], strides = [1, 1, 1]} : vector<4x8x32xf32> to vector<1x8x32xf32>
    %418 = vector.shape_cast %417 : vector<1x8x32xf32> to vector<8x32xf32>
    %419 = vector.broadcast %416 : vector<8x1xf32> to vector<8x32xf32>
    %420 = arith.mulf %419, %418 : vector<8x32xf32>
    %421 = vector.extract_strided_slice %325 {offsets = [1, 0, 3], sizes = [1, 8, 1], strides = [1, 1, 1]} : vector<4x8x5xf32> to vector<1x8x1xf32>
    %422 = vector.shape_cast %421 : vector<1x8x1xf32> to vector<8x1xf32>
    %423 = vector.extract_strided_slice %287 {offsets = [1, 0, 0], sizes = [1, 8, 32], strides = [1, 1, 1]} : vector<4x8x32xf32> to vector<1x8x32xf32>
    %424 = vector.shape_cast %423 : vector<1x8x32xf32> to vector<8x32xf32>
    %425 = vector.broadcast %422 : vector<8x1xf32> to vector<8x32xf32>
    %426 = arith.mulf %425, %424 : vector<8x32xf32>
    %427 = arith.addf %420, %426 : vector<8x32xf32>
    %428 = vector.extract_strided_slice %325 {offsets = [2, 0, 3], sizes = [1, 8, 1], strides = [1, 1, 1]} : vector<4x8x5xf32> to vector<1x8x1xf32>
    %429 = vector.shape_cast %428 : vector<1x8x1xf32> to vector<8x1xf32>
    %430 = vector.extract_strided_slice %287 {offsets = [2, 0, 0], sizes = [1, 8, 32], strides = [1, 1, 1]} : vector<4x8x32xf32> to vector<1x8x32xf32>
    %431 = vector.shape_cast %430 : vector<1x8x32xf32> to vector<8x32xf32>
    %432 = vector.broadcast %429 : vector<8x1xf32> to vector<8x32xf32>
    %433 = arith.mulf %432, %431 : vector<8x32xf32>
    %434 = arith.addf %427, %433 : vector<8x32xf32>
    %435 = vector.extract_strided_slice %325 {offsets = [3, 0, 3], sizes = [1, 8, 1], strides = [1, 1, 1]} : vector<4x8x5xf32> to vector<1x8x1xf32>
    %436 = vector.shape_cast %435 : vector<1x8x1xf32> to vector<8x1xf32>
    %437 = vector.extract_strided_slice %287 {offsets = [3, 0, 0], sizes = [1, 8, 32], strides = [1, 1, 1]} : vector<4x8x32xf32> to vector<1x8x32xf32>
    %438 = vector.shape_cast %437 : vector<1x8x32xf32> to vector<8x32xf32>
    %439 = vector.broadcast %436 : vector<8x1xf32> to vector<8x32xf32>
    %440 = arith.mulf %439, %438 : vector<8x32xf32>
    %441 = arith.addf %434, %440 : vector<8x32xf32>
    %442 = vector.extract_strided_slice %325 {offsets = [0, 0, 4], sizes = [1, 8, 1], strides = [1, 1, 1]} : vector<4x8x5xf32> to vector<1x8x1xf32>
    %443 = vector.shape_cast %442 : vector<1x8x1xf32> to vector<8x1xf32>
    %444 = vector.extract_strided_slice %287 {offsets = [0, 0, 0], sizes = [1, 8, 32], strides = [1, 1, 1]} : vector<4x8x32xf32> to vector<1x8x32xf32>
    %445 = vector.shape_cast %444 : vector<1x8x32xf32> to vector<8x32xf32>
    %446 = vector.broadcast %443 : vector<8x1xf32> to vector<8x32xf32>
    %447 = arith.mulf %446, %445 : vector<8x32xf32>
    %448 = vector.extract_strided_slice %325 {offsets = [1, 0, 4], sizes = [1, 8, 1], strides = [1, 1, 1]} : vector<4x8x5xf32> to vector<1x8x1xf32>
    %449 = vector.shape_cast %448 : vector<1x8x1xf32> to vector<8x1xf32>
    %450 = vector.extract_strided_slice %287 {offsets = [1, 0, 0], sizes = [1, 8, 32], strides = [1, 1, 1]} : vector<4x8x32xf32> to vector<1x8x32xf32>
    %451 = vector.shape_cast %450 : vector<1x8x32xf32> to vector<8x32xf32>
    %452 = vector.broadcast %449 : vector<8x1xf32> to vector<8x32xf32>
    %453 = arith.mulf %452, %451 : vector<8x32xf32>
    %454 = arith.addf %447, %453 : vector<8x32xf32>
    %455 = vector.extract_strided_slice %325 {offsets = [2, 0, 4], sizes = [1, 8, 1], strides = [1, 1, 1]} : vector<4x8x5xf32> to vector<1x8x1xf32>
    %456 = vector.shape_cast %455 : vector<1x8x1xf32> to vector<8x1xf32>
    %457 = vector.extract_strided_slice %287 {offsets = [2, 0, 0], sizes = [1, 8, 32], strides = [1, 1, 1]} : vector<4x8x32xf32> to vector<1x8x32xf32>
    %458 = vector.shape_cast %457 : vector<1x8x32xf32> to vector<8x32xf32>
    %459 = vector.broadcast %456 : vector<8x1xf32> to vector<8x32xf32>
    %460 = arith.mulf %459, %458 : vector<8x32xf32>
    %461 = arith.addf %454, %460 : vector<8x32xf32>
    %462 = vector.extract_strided_slice %325 {offsets = [3, 0, 4], sizes = [1, 8, 1], strides = [1, 1, 1]} : vector<4x8x5xf32> to vector<1x8x1xf32>
    %463 = vector.shape_cast %462 : vector<1x8x1xf32> to vector<8x1xf32>
    %464 = vector.extract_strided_slice %287 {offsets = [3, 0, 0], sizes = [1, 8, 32], strides = [1, 1, 1]} : vector<4x8x32xf32> to vector<1x8x32xf32>
    %465 = vector.shape_cast %464 : vector<1x8x32xf32> to vector<8x32xf32>
    %466 = vector.broadcast %463 : vector<8x1xf32> to vector<8x32xf32>
    %467 = arith.mulf %466, %465 : vector<8x32xf32>
    %468 = arith.addf %461, %467 : vector<8x32xf32>
    %469 = vector.shape_cast %387 : vector<8x32xf32> to vector<1x8x32xf32>
    %470 = vector.shape_cast %414 : vector<8x32xf32> to vector<1x8x32xf32>
    %471 = vector.shape_cast %441 : vector<8x32xf32> to vector<1x8x32xf32>
    %472 = vector.shape_cast %468 : vector<8x32xf32> to vector<1x8x32xf32>
    %473 = tpu.concatenate %469, %470, %471, %472 in 0 : vector<1x8x32xf32>, vector<1x8x32xf32>, vector<1x8x32xf32>, vector<1x8x32xf32> -> vector<4x8x32xf32>
    %474 = vector.extract_strided_slice %5 {offsets = [4, 0], sizes = [2, 32], strides = [1, 1]} : vector<24x128xf32> to vector<2x32xf32>
    %475 = vector.extract_strided_slice %474 {offsets = [0, 0], sizes = [1, 32], strides = [1, 1]} : vector<2x32xf32> to vector<1x32xf32>
    %476 = vector.shape_cast %475 : vector<1x32xf32> to vector<32xf32>
    %477 = vector.extract_strided_slice %474 {offsets = [1, 0], sizes = [1, 32], strides = [1, 1]} : vector<2x32xf32> to vector<1x32xf32>
    %478 = vector.shape_cast %477 : vector<1x32xf32> to vector<32xf32>
    %c0_38 = arith.constant 0 : index
    %c0_39 = arith.constant 0 : index
    %c0_40 = arith.constant 0 : index
    %479 = vector.load %arg7[%c0_38, %c0_39, %c0_40] : memref<1x32x64xf32, #tpu.memory_space<vmem>>, vector<1x32x64xf32>
    %480 = vector.shape_cast %479 : vector<1x32x64xf32> to vector<32x64xf32>
    %481 = vector.extract_strided_slice %5 {offsets = [6, 0], sizes = [1, 64], strides = [1, 1]} : vector<24x128xf32> to vector<1x64xf32>
    %482 = vector.shape_cast %481 : vector<1x64xf32> to vector<64xf32>
    %c0_41 = arith.constant 0 : index
    %c0_42 = arith.constant 0 : index
    %c0_43 = arith.constant 0 : index
    %483 = vector.load %arg8[%c0_41, %c0_42, %c0_43] : memref<1x64x32xf32, #tpu.memory_space<vmem>>, vector<1x64x32xf32>
    %484 = vector.shape_cast %483 : vector<1x64x32xf32> to vector<64x32xf32>
    %485 = vector.extract_strided_slice %5 {offsets = [7, 0], sizes = [1, 32], strides = [1, 1]} : vector<24x128xf32> to vector<1x32xf32>
    %486 = vector.shape_cast %485 : vector<1x32xf32> to vector<32xf32>
    %cst_44 = arith.constant dense<0.000000e+00> : vector<8xf32>
    %487 = vector.multi_reduction <add>, %360, %cst_44 [1] : vector<8x32xf32> to vector<8xf32>
    %488 = vector.shape_cast %487 : vector<8xf32> to vector<8x1xf32>
    %cst_45 = arith.constant 3.200000e+01 : f32
    %489 = vector.broadcast %cst_45 : f32 to vector<8x1xf32>
    %490 = arith.divf %488, %489 : vector<8x1xf32>
    %491 = vector.broadcast %490 : vector<8x1xf32> to vector<8x32xf32>
    %492 = arith.subf %360, %491 : vector<8x32xf32>
    %493 = arith.mulf %492, %492 : vector<8x32xf32>
    %cst_46 = arith.constant dense<0.000000e+00> : vector<8xf32>
    %494 = vector.multi_reduction <add>, %493, %cst_46 [1] : vector<8x32xf32> to vector<8xf32>
    %495 = vector.shape_cast %494 : vector<8xf32> to vector<8x1xf32>
    %cst_47 = arith.constant 3.200000e+01 : f32
    %496 = vector.broadcast %cst_47 : f32 to vector<8x1xf32>
    %497 = arith.divf %495, %496 : vector<8x1xf32>
    %498 = vector.broadcast %490 : vector<8x1xf32> to vector<8x32xf32>
    %499 = arith.subf %360, %498 : vector<8x32xf32>
    %cst_48 = arith.constant 9.99999974E-6 : f32
    %500 = vector.broadcast %cst_48 : f32 to vector<8x1xf32>
    %501 = arith.addf %497, %500 : vector<8x1xf32>
    %502 = math.rsqrt %501 : vector<8x1xf32>
    %503 = vector.broadcast %502 : vector<8x1xf32> to vector<8x32xf32>
    %504 = arith.mulf %499, %503 : vector<8x32xf32>
    %505 = vector.shape_cast %476 : vector<32xf32> to vector<1x32xf32>
    %506 = vector.broadcast %505 : vector<1x32xf32> to vector<8x32xf32>
    %507 = arith.mulf %504, %506 : vector<8x32xf32>
    %508 = vector.shape_cast %478 : vector<32xf32> to vector<1x32xf32>
    %509 = vector.broadcast %508 : vector<1x32xf32> to vector<8x32xf32>
    %510 = arith.addf %507, %509 : vector<8x32xf32>
    %cst_49 = arith.constant dense<0.000000e+00> : vector<8x64xf32>
    %511 = tpu.matmul %510, %480, %cst_49 {dimension_numbers = #tpu.dot_dimension_numbers<[1], [0], [0], [1], [0, 0, 1, 1], [], []>} : vector<8x32xf32>, vector<32x64xf32>, vector<8x64xf32> -> vector<8x64xf32>
    %512 = vector.shape_cast %482 : vector<64xf32> to vector<1x64xf32>
    %513 = vector.broadcast %512 : vector<1x64xf32> to vector<8x64xf32>
    %514 = arith.addf %511, %513 : vector<8x64xf32>
    %cst_50 = arith.constant 5.000000e-01 : f32
    %515 = vector.broadcast %cst_50 : f32 to vector<8x64xf32>
    %516 = arith.mulf %515, %514 : vector<8x64xf32>
    %cst_51 = arith.constant 0.707106769 : f32
    %517 = vector.broadcast %cst_51 : f32 to vector<8x64xf32>
    %518 = arith.mulf %514, %517 : vector<8x64xf32>
    %519 = math.absf %518 : vector<8x64xf32>
    %cst_52 = arith.constant 0.327591091 : f32
    %520 = vector.broadcast %cst_52 : f32 to vector<8x64xf32>
    %521 = arith.mulf %520, %519 : vector<8x64xf32>
    %cst_53 = arith.constant 1.000000e+00 : f32
    %522 = vector.broadcast %cst_53 : f32 to vector<8x64xf32>
    %523 = arith.addf %522, %521 : vector<8x64xf32>
    %cst_54 = arith.constant 1.000000e+00 : f32
    %524 = vector.broadcast %cst_54 : f32 to vector<8x64xf32>
    %525 = arith.divf %524, %523 : vector<8x64xf32>
    %cst_55 = arith.constant 1.06140542 : f32
    %526 = vector.broadcast %cst_55 : f32 to vector<8x64xf32>
    %527 = arith.mulf %526, %525 : vector<8x64xf32>
    %cst_56 = arith.constant -1.45315206 : f32
    %528 = vector.broadcast %cst_56 : f32 to vector<8x64xf32>
    %529 = arith.addf %527, %528 : vector<8x64xf32>
    %530 = arith.mulf %529, %525 : vector<8x64xf32>
    %cst_57 = arith.constant 1.42141378 : f32
    %531 = vector.broadcast %cst_57 : f32 to vector<8x64xf32>
    %532 = arith.addf %530, %531 : vector<8x64xf32>
    %533 = arith.mulf %532, %525 : vector<8x64xf32>
    %cst_58 = arith.constant -0.284496725 : f32
    %534 = vector.broadcast %cst_58 : f32 to vector<8x64xf32>
    %535 = arith.addf %533, %534 : vector<8x64xf32>
    %536 = arith.mulf %535, %525 : vector<8x64xf32>
    %cst_59 = arith.constant 0.254829586 : f32
    %537 = vector.broadcast %cst_59 : f32 to vector<8x64xf32>
    %538 = arith.addf %536, %537 : vector<8x64xf32>
    %539 = arith.mulf %538, %525 : vector<8x64xf32>
    %cst_60 = arith.constant 0.000000e+00 : f32
    %540 = vector.broadcast %cst_60 : f32 to vector<8x64xf32>
    %541 = arith.subf %540, %519 : vector<8x64xf32>
    %542 = arith.mulf %541, %519 : vector<8x64xf32>
    %543 = math.exp %542 : vector<8x64xf32>
    %544 = arith.mulf %539, %543 : vector<8x64xf32>
    %cst_61 = arith.constant 1.000000e+00 : f32
    %545 = vector.broadcast %cst_61 : f32 to vector<8x64xf32>
    %546 = arith.subf %545, %544 : vector<8x64xf32>
    %cst_62 = arith.constant 0.000000e+00 : f32
    %547 = vector.broadcast %cst_62 : f32 to vector<8x64xf32>
    %548 = arith.cmpf oge, %518, %547 : vector<8x64xf32>
    %cst_63 = arith.constant 0.000000e+00 : f32
    %549 = vector.broadcast %cst_63 : f32 to vector<8x64xf32>
    %550 = arith.subf %549, %546 : vector<8x64xf32>
    %551 = arith.select %548, %546, %550 : vector<8x64xi1>, vector<8x64xf32>
    %cst_64 = arith.constant 1.000000e+00 : f32
    %552 = vector.broadcast %cst_64 : f32 to vector<8x64xf32>
    %553 = arith.addf %552, %551 : vector<8x64xf32>
    %554 = arith.mulf %516, %553 : vector<8x64xf32>
    %cst_65 = arith.constant dense<0.000000e+00> : vector<8x32xf32>
    %555 = tpu.matmul %554, %484, %cst_65 {dimension_numbers = #tpu.dot_dimension_numbers<[1], [0], [0], [1], [0, 0, 1, 1], [], []>} : vector<8x64xf32>, vector<64x32xf32>, vector<8x32xf32> -> vector<8x32xf32>
    %556 = vector.shape_cast %486 : vector<32xf32> to vector<1x32xf32>
    %557 = vector.broadcast %556 : vector<1x32xf32> to vector<8x32xf32>
    %558 = arith.addf %555, %557 : vector<8x32xf32>
    %559 = vector.shape_cast %558 : vector<8x32xf32> to vector<1x8x32xf32>
    %560 = vector.broadcast %333 : vector<4x8x1xf32> to vector<4x8x32xf32>
    %561 = vector.broadcast %559 : vector<1x8x32xf32> to vector<4x8x32xf32>
    %562 = arith.mulf %560, %561 : vector<4x8x32xf32>
    %563 = arith.addf %473, %562 : vector<4x8x32xf32>
    %c0_66 = arith.constant 0 : index
    %c0_67 = arith.constant 0 : index
    %c0_68 = arith.constant 0 : index
    %564 = vector.load %arg11[%c0_66, %c0_67, %c0_68] : memref<4x8x32xf32, #tpu.memory_space<vmem>>, vector<4x8x32xf32>
    tpu.vector_store %arg11[%c0_66, %c0_67, %c0_68], %563 {strides = array<i32>} : memref<4x8x32xf32, #tpu.memory_space<vmem>>, vector<4x8x32xf32>,
    %c1_i32 = arith.constant 1 : i32
    %565 = arith.cmpi eq, %arg1, %c1_i32 : i32
    %566 = arith.extui %565 : i1 to i32
    %c0_i32_69 = arith.constant 0 : i32
    %567 = arith.cmpi ne, %566, %c0_i32_69 : i32
    scf.if %567 {
      %c0_70 = arith.constant 0 : index
      %c0_71 = arith.constant 0 : index
      %568 = vector.load %arg9[%c0_70, %c0_71] : memref<2x32xf32, #tpu.memory_space<vmem>>, vector<2x32xf32>
      %cst_72 = arith.constant dense<0.000000e+00> : vector<8x32xf32>
      %569 = vector.multi_reduction <add>, %563, %cst_72 [0] : vector<4x8x32xf32> to vector<8x32xf32>
      %570 = vector.extract_strided_slice %568 {offsets = [0, 0], sizes = [1, 32], strides = [1, 1]} : vector<2x32xf32> to vector<1x32xf32>
      %571 = vector.shape_cast %570 : vector<1x32xf32> to vector<32xf32>
      %572 = vector.extract_strided_slice %568 {offsets = [1, 0], sizes = [1, 32], strides = [1, 1]} : vector<2x32xf32> to vector<1x32xf32>
      %573 = vector.shape_cast %572 : vector<1x32xf32> to vector<32xf32>
      %cst_73 = arith.constant dense<0.000000e+00> : vector<8xf32>
      %574 = vector.multi_reduction <add>, %569, %cst_73 [1] : vector<8x32xf32> to vector<8xf32>
      %575 = vector.shape_cast %574 : vector<8xf32> to vector<8x1xf32>
      %cst_74 = arith.constant 3.200000e+01 : f32
      %576 = vector.broadcast %cst_74 : f32 to vector<8x1xf32>
      %577 = arith.divf %575, %576 : vector<8x1xf32>
      %578 = vector.broadcast %577 : vector<8x1xf32> to vector<8x32xf32>
      %579 = arith.subf %569, %578 : vector<8x32xf32>
      %580 = arith.mulf %579, %579 : vector<8x32xf32>
      %cst_75 = arith.constant dense<0.000000e+00> : vector<8xf32>
      %581 = vector.multi_reduction <add>, %580, %cst_75 [1] : vector<8x32xf32> to vector<8xf32>
      %582 = vector.shape_cast %581 : vector<8xf32> to vector<8x1xf32>
      %cst_76 = arith.constant 3.200000e+01 : f32
      %583 = vector.broadcast %cst_76 : f32 to vector<8x1xf32>
      %584 = arith.divf %582, %583 : vector<8x1xf32>
      %585 = vector.broadcast %577 : vector<8x1xf32> to vector<8x32xf32>
      %586 = arith.subf %569, %585 : vector<8x32xf32>
      %cst_77 = arith.constant 9.99999974E-6 : f32
      %587 = vector.broadcast %cst_77 : f32 to vector<8x1xf32>
      %588 = arith.addf %584, %587 : vector<8x1xf32>
      %589 = math.rsqrt %588 : vector<8x1xf32>
      %590 = vector.broadcast %589 : vector<8x1xf32> to vector<8x32xf32>
      %591 = arith.mulf %586, %590 : vector<8x32xf32>
      %592 = vector.shape_cast %571 : vector<32xf32> to vector<1x32xf32>
      %593 = vector.broadcast %592 : vector<1x32xf32> to vector<8x32xf32>
      %594 = arith.mulf %591, %593 : vector<8x32xf32>
      %595 = vector.shape_cast %573 : vector<32xf32> to vector<1x32xf32>
      %596 = vector.broadcast %595 : vector<1x32xf32> to vector<8x32xf32>
      %597 = arith.addf %594, %596 : vector<8x32xf32>
      %598 = vector.extract_strided_slice %597 {offsets = [0, 0], sizes = [1, 32], strides = [1, 1]} : vector<8x32xf32> to vector<1x32xf32>
      %599 = vector.extract_strided_slice %597 {offsets = [1, 0], sizes = [1, 32], strides = [1, 1]} : vector<8x32xf32> to vector<1x32xf32>
      %600 = vector.extract_strided_slice %597 {offsets = [2, 0], sizes = [1, 32], strides = [1, 1]} : vector<8x32xf32> to vector<1x32xf32>
      %601 = vector.extract_strided_slice %597 {offsets = [3, 0], sizes = [1, 32], strides = [1, 1]} : vector<8x32xf32> to vector<1x32xf32>
      %602 = vector.extract_strided_slice %597 {offsets = [4, 0], sizes = [1, 32], strides = [1, 1]} : vector<8x32xf32> to vector<1x32xf32>
      %603 = vector.extract_strided_slice %597 {offsets = [5, 0], sizes = [1, 32], strides = [1, 1]} : vector<8x32xf32> to vector<1x32xf32>
      %604 = vector.extract_strided_slice %597 {offsets = [6, 0], sizes = [1, 32], strides = [1, 1]} : vector<8x32xf32> to vector<1x32xf32>
      %605 = vector.extract_strided_slice %597 {offsets = [7, 0], sizes = [1, 32], strides = [1, 1]} : vector<8x32xf32> to vector<1x32xf32>
      %606 = tpu.concatenate %598, %599, %600, %601, %602, %603, %604, %605 in 1 : vector<1x32xf32>, vector<1x32xf32>, vector<1x32xf32>, vector<1x32xf32>, vector<1x32xf32>, vector<1x32xf32>, vector<1x32xf32>, vector<1x32xf32> -> vector<1x256xf32>
      %607 = vector.shape_cast %606 : vector<1x256xf32> to vector<1x1x256xf32>
      %c0_78 = arith.constant 0 : index
      %c0_79 = arith.constant 0 : index
      %c0_80 = arith.constant 0 : index
      %608 = vector.load %arg10[%c0_78, %c0_79, %c0_80] : memref<1x1x256xf32, #tpu.memory_space<vmem>>, vector<1x1x256xf32>
      tpu.vector_store %arg10[%c0_78, %c0_79, %c0_80], %607 {strides = array<i32>} : memref<1x1x256xf32, #tpu.memory_space<vmem>>, vector<1x1x256xf32>,
    } else {
    }
    return
  }
  func.func @transform_0(%arg0: i32, %arg1: i32) -> (i32, i32, i32) {
    %c0_i32 = arith.constant 0 : i32
    %c0_i32_0 = arith.constant 0 : i32
    %c0_i32_1 = arith.constant 0 : i32
    return %arg0, %c0_i32, %c0_i32_0 : i32, i32, i32
  }
  func.func @transform_1(%arg0: i32, %arg1: i32) -> (i32, i32, i32) {
    %c0_i32 = arith.constant 0 : i32
    %c0_i32_0 = arith.constant 0 : i32
    %c0_i32_1 = arith.constant 0 : i32
    return %arg1, %c0_i32, %c0_i32_0 : i32, i32, i32
  }
  func.func @transform_2(%arg0: i32, %arg1: i32) -> (i32, i32, i32) {
    %c0_i32 = arith.constant 0 : i32
    %c0_i32_0 = arith.constant 0 : i32
    %c0_i32_1 = arith.constant 0 : i32
    return %arg1, %c0_i32, %c0_i32_0 : i32, i32, i32
  }
  func.func @transform_3(%arg0: i32, %arg1: i32) -> (i32, i32, i32) {
    %c0_i32 = arith.constant 0 : i32
    %c0_i32_0 = arith.constant 0 : i32
    %c0_i32_1 = arith.constant 0 : i32
    return %arg1, %c0_i32, %c0_i32_0 : i32, i32, i32
  }
  func.func @transform_4(%arg0: i32, %arg1: i32) -> (i32, i32, i32) {
    %c0_i32 = arith.constant 0 : i32
    %c0_i32_0 = arith.constant 0 : i32
    %c0_i32_1 = arith.constant 0 : i32
    return %arg1, %c0_i32, %c0_i32_0 : i32, i32, i32
  }
  func.func @transform_5(%arg0: i32, %arg1: i32) -> (i32, i32, i32) {
    %c0_i32 = arith.constant 0 : i32
    %c0_i32_0 = arith.constant 0 : i32
    %c0_i32_1 = arith.constant 0 : i32
    return %arg1, %c0_i32, %c0_i32_0 : i32, i32, i32
  }
  func.func @transform_6(%arg0: i32, %arg1: i32) -> (i32, i32, i32) {
    %c0_i32 = arith.constant 0 : i32
    %c0_i32_0 = arith.constant 0 : i32
    %c0_i32_1 = arith.constant 0 : i32
    return %arg1, %c0_i32, %c0_i32_0 : i32, i32, i32
  }
  func.func @transform_7(%arg0: i32, %arg1: i32) -> (i32, i32) {
    %c0_i32 = arith.constant 0 : i32
    %c0_i32_0 = arith.constant 0 : i32
    %c0_i32_1 = arith.constant 0 : i32
    return %c0_i32, %c0_i32_0 : i32, i32
  }
  func.func @transform_8(%arg0: i32, %arg1: i32) -> (i32, i32, i32) {
    %c0_i32 = arith.constant 0 : i32
    %c0_i32_0 = arith.constant 0 : i32
    %c0_i32_1 = arith.constant 0 : i32
    return %arg0, %c0_i32, %c0_i32_0 : i32, i32, i32
  }
}

</mosaic_0001>

<bundles_post_ra>
// kernel: _lambda_.1
= control target key start
LH: loop header
LB: loop body
LE: loop exit
PB: predicated region body
PF: predicated region fallthrough
CT: control target
= control target key end

     0   :  { %s3096_s27 = smov 0   ;;  %s3098_s28 = smov 0   ;;  %s3607_s0 = inlined_call_operand.vmem [shape: f32[2,8,32], index: 0, kind: input, shape index: {}]   ;;  %s3608_s1 = inlined_call_operand.vmem [shape: f32[2,24,128], index: 1, kind: input, shape index: {}]   ;;  %s3609_s2 = inlined_call_operand.vmem [shape: f32[2,32,12], index: 2, kind: input, shape index: {}]   ;;  %s3610_s3 = inlined_call_operand.vmem [shape: f32[2,32,192], index: 3, kind: input, shape index: {}]   ;;  %s3611_s4 = inlined_call_operand.vmem [shape: f32[2,64,32], index: 4, kind: input, shape index: {}]   ;;  %s3612_s5 = inlined_call_operand.vmem [shape: f32[2,32,64], index: 5, kind: input, shape index: {}]   ;;  %s3613_s6 = inlined_call_operand.vmem [shape: f32[2,64,32], index: 6, kind: input, shape index: {}]   ;;  %s3614_s7 = inlined_call_operand.vmem [shape: f32[2,32], index: 7, kind: input, shape index: {}]   ;;  %s3615_s8 = inlined_call_operand.vmem [shape: f32[2,1,256], index: 8, kind: output, shape index: {}]  }
   0x1   :  { %3616 = sst [smem:[#allocation5_spill]] %s3607_s0  ;;  %s3100_s29 = smov 0  }
   0x2   :  { %3617 = sst [smem:[#allocation6_spill]] %s3608_s1  ;;  %s3102_s30 = smov 0  }
   0x3   :  { %s3104_s9 = smov 0  }
   0x4 LB: > { %s27_s10 = sadd.s32 1, %s3011_s29  ;;  %s30_s11 = sadd.s32 1, %s3015_s30  ;;  %s3019_s9 = sphi %s3104_s9, %s18_s9   ;;  %s3015_s30 = sphi %s3102_s30, %s3627_s30   ;;  %s3011_s29 = sphi %s3100_s29, %s3626_s29   ;;  %s3007_s28 = sphi %s3098_s28, %s3625_s28   ;;  %s3003_s27 = sphi %s3096_s27, %s3624_s27  }
   0x5   : > { %p28_p0 = scmp.ge.s32.totalorder %s27_s10, 2  ;;  %p2540_p1 = scmp.ge.s32.totalorder %s3019_s9, 1 }
   0x6   : > { %p333_p2 = scmp.lt.s32.totalorder %s3019_s9, 5 }
   0x7   : > { %s3629_s10 = smov (%p28_p0, %s27_s10), 0  ;;  %s3631_s11 = smov (!%p28_p0, %s30_s11), %s3015_s30 }
   0x8   : > { %3618 = sst [smem:[#allocation3_spill]] %s3629_s10  ;;  %p334_p3 = pnand %p2540_p1, %p333_p2 }
   0x9   : > { %p32_p4 = scmp.ge.s32.totalorder %s3631_s11, 2  ;;  %p395_p5 = scmp.lt.s32.totalorder (!%p334_p3), %s3007_s28, 1 }
   0xa   : > { %337 = sbr.rel (%p334_p3) target bundleno = 4489 (0x1189), region = 52  ;;  %p399_p6 = scmp.lt.s32.totalorder (!%p334_p3), %s3003_s27, 1 }
   0xb   : > { %s3633_s11 = smov (%p32_p4, %s3631_s11), 0  ;;  %s3620_s0 = sld [smem:[#allocation5_spill]] (!%p334_p3) }
   0xc   : > { %3619 = sst [smem:[#allocation4_spill]] %s3633_s11  ;;  %s3621_s1 = sld [smem:[#allocation6_spill]] (!%p334_p3) }
   0xd   : > { %p2554_p7 = scmp.ne.s32.totalorder (!%p334_p3), %s3003_s27, 0 }
  0x11   : > { %s3635_s28 = smov (!%p395_p5, %s3007_s28), 1  ;;  %vm438_vm0 = vcmask (!%p2554_p7), 261120  }
  0x12   : > { %s400_s12 = scalar_select %p399_p6, %s3003_s27, 1 }
  0x13   : > { %s2541_s13 = sshll.u32 %s3635_s28, 3  ;;  %s2553_s14 = sshll.u32 %s3635_s28, 1 }
  0x14   : > { %s398_s17 = scalar_lea.vmem %s3620_s0, %s2541_s13  ;;  %s2813_s18 = smul.u32 24, %s400_s12 }
  0x15   : > { %s2582_s19 = sshll.u32 %s400_s12, 5  ;;  %s2583_s20 = sshll.u32 %s400_s12, 6  ;;  %v437_v0 = vld [vmem:[%s398_s17] sm:$0xff] (!%p2554_p7) }
  0x16   : > { %s3136_s23 = scalar_lea.vmem %s3621_s1, %s2813_s18  ;;  %s3141_s26 = scalar_lea.vmem %s3609_s2, %s2582_s19  ;;  %439 = vst.msk [vmem:[#allocation2] sm:$0xff] (!%p2554_p7), %vm438_vm0, %v437_v0  ;;  %440 = vst.msk [vmem:[#allocation2 + $0x8] sm:$0xff] (!%p2554_p7), %vm438_vm0, %v437_v0 }
  0x17   : > { %s3146_s28 = scalar_lea.vmem %s3610_s3, %s2583_s20  ;;  %s3151_s16 = scalar_lea.vmem %s3611_s4, %s2583_s20  ;;  %441 = vst.msk [vmem:[#allocation2 + $0x10] sm:$0xff] (!%p2554_p7), %vm438_vm0, %v437_v0  ;;  %442 = vst.msk [vmem:[#allocation2 + $0x18] sm:$0xff] (!%p2554_p7), %vm438_vm0, %v437_v0 }
  0x18   : > { %s3156_s18 = scalar_lea.vmem %s3612_s5, %s2582_s19  ;;  %s3161_s24 = scalar_lea.vmem %s3613_s6, %s2583_s20 }
  0x19   : > { %s3166_s10 = scalar_lea.vmem %s3615_s8, %s2553_s14  ;;  %436 = sbr.rel (%p2554_p7) target bundleno = 32 (0x20), region = 56 }
  0x20 PF: > { %v3169_v1 = vld [vmem:[#allocation2] sm:$0xff]  ;;  %vm454_vm1 = vcmask 261120   ;;  %v3171_v2 = vld [vmem:[#allocation2 + $0x10] sm:$0xff]  ;;  %v3173_v3 = vld [vmem:[#allocation2 + $0x8] sm:$0xff]  ;;  %v508_v38 = vlaneseq  ;;  %vm3024_vm2 = vmmov 0   ;;  %s3025_s1 = smov 96  }
  0x21   : > { %v455_v4 = vsel %vm454_vm1, %v3169_v1, 0.0  ;;  %v461_v5 = vsel %vm454_vm1, %v3171_v2, 0.0  ;;  %v3179_v6 = vld [vmem:[#allocation2 + $0x18] sm:$0xff]  ;;  %v458_v7 = vsel %vm454_vm1, %v3173_v3, 0.0  ;;  %v450_v29 = vld [vmem:[%s3141_s26] sm:$0xff]  ;;  %v451_v30 = vld [vmem:[%s3141_s26 + $0x8] sm:$0xff] }
  0x22   : > { %456 = vadd.xlane.f32.xlu0 %v455_v4  ;;  %462 = vadd.xlane.f32.xlu1 %v461_v5  ;;  %v464_v8 = vsel %vm454_vm1, %v3179_v6, 0.0  ;;  %v452_v31 = vld [vmem:[%s3141_s26 + $0x10] sm:$0xff]  ;;  %v3196_v32 = vpack.c.bf16 %v451_v30, %v450_v29  ;;  %v453_v33 = vld [vmem:[%s3141_s26 + $0x18] sm:$0xff]  ;;  %v3210_v44 = vshrl.u32 %v508_v38, 7  ;;  %v3216_v51 = vld [vmem:[%s3136_s23] sm:$0xff]  ;;  %v3021_v4 = vmov 0  }
  0x23   : > { %v3199_v34 = vpack.c.bf16 %v453_v33, %v452_v31  ;;  %v3206_v35 = vld [vmem:[%s3136_s23 + $0x10] sm:$0xff]  ;;  %2889 = vset.pattern.permute.xlu1 %v3021_v4  ;;  %2888 = vset.pattern.permute.xlu0 %v3021_v4  ;;  %v3022_v5 = vmov 1966171168   ;;  %v809_v4 = vld [vmem:[%s3146_s28] sm:$0xff]  ;;  %s3026_s11 = smov 112   ;;  %s3027_s14 = smov 80  }
  0x24   : > { %2760 = vmatprep.subr.bf16.mxu0 %v3196_v32  ;;  %2814 = vpush %v3206_v35  ;;  %v3213_v49 = vsub.s32 0, %v3210_v44  ;;  %s3028_s17 = smov 64   ;;  %vm941_vm3 = vcmask 130048   ;;  %vm1248_vm4 = vcmask 64512   ;;  %s3031_s19 = smov 16   ;;  %vm1599_vm5 = vcmask 392192  }
  0x25   : > { %2762 = vmatpush3.bf16.msra.mxu0 %v3196_v32  ;;  %s3032_s20 = smov 32   ;;  %s3033_s26 = smov 4   ;;  %vm1601_vm6 = vcmask 523264  }
  0x26   : > { %459 = vadd.xlane.f32.xlu0 %v458_v7  ;;  %465 = vadd.xlane.f32.xlu1 %v464_v8  ;;  %v511_v52 = vrot.slane %v3216_v51, %v3213_v49  ;;  %v627_v7 = vunpack.c.l.s4 %v3022_v5  ;;  %v811_v5 = vld [vmem:[%s3146_s28 + $0x10] sm:$0xff]  ;;  %s3039_s15 = smov 126   ;;  %s3040_s13 = smov 6  }
  0x27   : > { %2764 = vmatprep.subr.bf16.mxu0 %v3199_v34  ;;  %s3043_s12 = smov 8   ;;  %p2579_p8 = scmp.ne.s32.totalorder %s3003_s27, 1 }
  0x28   : > { %v628_v8 = vunpack.c.0.s8 %v627_v7  ;;  %v2769_v7 = vpack.c.bf16 %v811_v5, %v809_v4  ;;  %s3049_s21 = smov (!%p2579_p8), 32   ;;  %s3050_s22 = smov (!%p2579_p8), 96   ;;  %vm2372_vm8 = vcmask (!%p2579_p8), 785408   ;;  %vm2397_vm9 = vcmp.lt.s32.totalorder (!%p2579_p8), %v508_v38, 256 }
  0x29   : > { %2766 = vmatpush3.bf16.msra.mxu0 %v3199_v34 }
  0x55   : > { %s2815_s0 = spop %2814 }
  0xaf   : > { %v457_v9 = vpop.xlane.xlu0 %456  ;;  %v463_v10 = vpop.xlane.xlu1 %462 }
  0xb0   : > { %v468_v11 = vmul.f32 0.03125, %v457_v9  ;;  %v470_v12 = vmul.f32 0.03125, %v463_v10  ;;  %v3225_v9 = vsub.s32 %v628_v8, %v3210_v44  ;;  %v3228_v10 = vld [vmem:[%s3136_s23 + $0x8] sm:$0xff] }
  0xb1   : > { %v814_v8 = vld [vmem:[%s3146_s28 + $0x28] sm:$0xff] }
  0xb2   : > { %v472_v13 = vsub.f32 %v3169_v1, %v468_v11  ;;  %v474_v14 = vsub.f32 %v3171_v2, %v470_v12  ;;  %v632_v11 = vrot.slane %v3228_v10, %v3225_v9 }
  0xb3   : > { %v460_v15 = vpop.xlane.xlu0 %459  ;;  %v466_v16 = vpop.xlane.xlu1 %465 }
  0xb4   : > { %v469_v17 = vmul.f32 0.03125, %v460_v15  ;;  %v471_v18 = vmul.f32 0.03125, %v466_v16  ;;  %v476_v19 = vmul.f32 %v472_v13, %v472_v13  ;;  %v478_v20 = vmul.f32 %v474_v14, %v474_v14 }
  0xb6   : > { %v473_v21 = vsub.f32 %v3173_v3, %v469_v17  ;;  %v475_v22 = vsub.f32 %v3179_v6, %v471_v18  ;;  %v480_v23 = vsel %vm454_vm1, %v476_v19, 0.0  ;;  %v486_v24 = vsel %vm454_vm1, %v478_v20, 0.0 }
  0xb7   : > { %481 = vadd.xlane.f32.xlu0 %v480_v23  ;;  %v640_v18 = vrot.slane %v632_v11, %v3225_v9  ;;  %v619_v19 = vstv %s2815_s0 }
  0xb8   : > { %v477_v25 = vmul.f32 %v473_v21, %v473_v21  ;;  %v479_v26 = vmul.f32 %v475_v22, %v475_v22 }
  0xb9   : > { %v3240_v23 = vrot.slane %v640_v18, %v3213_v49 }
  0xba   : > { %v483_v27 = vsel %vm454_vm1, %v477_v25, 0.0  ;;  %v489_v28 = vsel %vm454_vm1, %v479_v26, 0.0 }
  0xbb   : > { %487 = vadd.xlane.f32.xlu0 %v486_v24  ;;  %484 = vadd.xlane.f32.xlu1 %v483_v27 }
  0xbf   : > { %490 = vadd.xlane.f32.xlu1 %v489_v28 }
 0x144   : > { %v482_v36 = vpop.xlane.xlu0 %481 }
 0x145   : > { %v492_v37 = vmul.f32 0.03125, %v482_v36 }
 0x147   : > { %v496_v39 = vadd.f32 1e-05, %v492_v37 }
 0x148   : > { %v485_v40 = vpop.xlane.xlu1 %484  ;;  %v488_v41 = vpop.xlane.xlu0 %487 }
 0x149   : > { %2922 = vrsqrt.f32 %v496_v39  ;;  %v493_v42 = vmul.f32 0.03125, %v485_v40  ;;  %v494_v43 = vmul.f32 0.03125, %v488_v41 }
 0x14b   : > { %v497_v45 = vadd.f32 1e-05, %v493_v42  ;;  %v498_v46 = vadd.f32 1e-05, %v494_v43 }
 0x14c   : > { %v491_v47 = vpop.xlane.xlu1 %490 }
 0x14d   : > { %2924 = vrsqrt.f32 %v497_v45  ;;  %v495_v48 = vmul.f32 0.03125, %v491_v47 }
 0x14e   : > { %2926 = vrsqrt.f32 %v498_v46 }
 0x14f   : > { %v499_v50 = vadd.f32 1e-05, %v495_v48 }
 0x151   : > { %2928 = vrsqrt.f32 %v499_v50 }
 0x153   : > { %v2923_v53 = vpop.eup %2922 }
 0x154   : > { %v504_v54 = vmul.f32 %v2923_v53, %v472_v13 }
 0x156   : > { %v512_v55 = vmul.f32 %v511_v52, %v504_v54 }
 0x157   : > { %v2925_v56 = vpop.eup %2924 }
 0x158   : > { %v2927_v57 = vpop.eup %2926  ;;  %2650 = vmatprep.mubr.msk.f32.mxu0 %vm454_vm1, %v512_v55  ;;  %v505_v58 = vmul.f32 %v2925_v56, %v473_v21 }
 0x159   : > { %v506_v59 = vmul.f32 %v2927_v57, %v474_v14  ;;  %v633_v14 = vcombine.high %v632_v11, %v632_v11  ;;  %v816_v11 = vld [vmem:[%s3146_s28 + $0x38] sm:$0xff] }
 0x15a   : > { %v513_v60 = vmul.f32 %v511_v52, %v505_v58 }
 0x15b   : > { %v2929_v61 = vpop.eup %2928  ;;  %v514_v62 = vmul.f32 %v511_v52, %v506_v59  ;;  %v647_v17 = vrot.slane %v633_v14, %v3225_v9  ;;  %v815_v14 = vld [vmem:[%s3146_s28 + $0x30] sm:$0xff] }
 0x15c   : > { %2651 = vmatmul.mubr.msk.f32.vlgmr.msra.gmra.mrb[0].mxu0 %vm454_vm1, %v513_v60  ;;  %v507_v63 = vmul.f32 %v2929_v61, %v475_v22  ;;  %v648_v22 = vcombine.high %v640_v18, %v640_v18 }
 0x15d   : > { %2653 = vmatprep.mubr.msk.f32.mxu0 %vm454_vm1, %v514_v62  ;;  %v3235_v20 = vrot.slane %v647_v17, %v3213_v49  ;;  %v649_v29 = vcombine.high %v647_v17, %v647_v17  ;;  %v810_v62 = vld [vmem:[%s3146_s28 + $0x8] sm:$0xff] }
 0x15e   : > { %v515_v0 = vmul.f32 %v511_v52, %v507_v63  ;;  %v3252_v30 = vrot.slane %v648_v22, %v3213_v49  ;;  %v812_v63 = vld [vmem:[%s3146_s28 + $0x18] sm:$0xff]  ;;  %v840_v22 = vsub.s32 2, %v3210_v44 }
 0x15f   : > { %v3264_v39 = vrot.slane %v649_v29, %v3213_v49 }
 0x160   : > { %2654 = vmatmul.mubr.msk.f32.gmra.mrb[2].mxu0 %vm454_vm1, %v515_v0  ;;  %v2767_v0 = vpack.c.bf16 %v812_v63, %v810_v62 }
 0x162   : > { %2768 = vmatprep.subr.bf16.mxu0 %v2767_v0 }
 0x163   : > { %2770 = vmatpush1.bf16.msra.mxu0 %v2769_v7 }
 0x22f   : > { %v2652_v12 = vpop.f32.mrb[0].mxu0 }
 0x230   : > { %2930 = vtanh.f32 %v2652_v12  ;;  %v594_v13 = vpop.f32.mrb[1].mxu0  ;;  %v2771_v12 = vpack.c.bf16 %v816_v11, %v814_v8 }
 0x231   : > { %2932 = vtanh.f32 %v594_v13  ;;  %v813_v13 = vld [vmem:[%s3146_s28 + $0x20] sm:$0xff]  ;;  %s3034_s28 = smov 48  }
 0x232   : > { %2772 = vmatprep.subr.bf16.mxu0 %v2771_v12 }
 0x233   : > { %v2655_v15 = vpop.f32.mrb[2].mxu0 }
 0x234   : > { %2934 = vtanh.f32 %v2655_v15  ;;  %v604_v16 = vpop.f32.mrb[3].mxu0  ;;  %v2773_v15 = vpack.c.bf16 %v815_v14, %v813_v13 }
 0x235   : > { %2936 = vtanh.f32 %v604_v16  ;;  %v3023_v16 = vmov 0.0  }
 0x236   : > { %2774 = vmatpush1.bf16.msra.mxu0 %v2773_v15  ;;  %915 = vmatprep.mubr.f32.mxu0 %v3023_v16 }
 0x237   : > { %2656 = vmatprep.subr.mxu1 %v3023_v16  ;;  %2661 = vmatprep.subr.mxu0 %v3023_v16 }
 0x238   : > { %2658 = vmatprep.mubr.msk.f32.mxu1 %vm3024_vm2, %v3023_v16 }
 0x23a   : > { %v3237_v21 = vpop.eup %2930 }
 0x23b   : > { %v3242_v24 = vpop.eup %2932  ;;  %v622_v25 = vmul.f32 %v3237_v21, %v619_v19 }
 0x23c   : > { %v621_v26 = vmul.f32 %v3242_v24, %v619_v19 }
 0x23d   : > { %v3247_v27 = vadd.f32 %v3235_v20, %v622_v25  ;;  %v845_v25 = vsub.s32 3, %v3210_v44 }
 0x23e   : > { %v3249_v28 = vpop.eup %2934  ;;  %v3255_v31 = vadd.f32 %v3240_v23, %v621_v26  ;;  %v841_v26 = vrot.slane %v3216_v51, %v840_v22 }
 0x23f   : > { %v3257_v33 = vpop.eup %2936  ;;  %698 = vperm.xlu1 %2889, %v3247_v27   ;;  %v624_v37 = vmul.f32 %v3249_v28, %v619_v19 }
 0x240   : > { %v623_v36 = vmul.f32 %v3257_v33, %v619_v19  ;;  %692 = vperm.xlu0 %2888, %v3255_v31  }
 0x241   : > { %v3271_v41 = vadd.f32 %v3264_v39, %v624_v37 }
 0x242   : > { %v3267_v40 = vadd.f32 %v3252_v30, %v623_v36  ;;  %v846_v36 = vrot.slane %v3216_v51, %v845_v25 }
 0x244   : > { %705 = vperm.xlu1 %2889, %v3267_v40  }
 0x248   : > { %712 = vperm.xlu1 %2889, %v3271_v41  }
 0x2be   : > { %v699_v42 = vpop.permute.xlu1 %698 }
 0x2bf   : > { %v693_v43 = vpop.permute.xlu0 %692  ;;  %v701_v45 = vmul.f32 %v699_v42, %v3173_v3 }
 0x2c0   : > { %v695_v46 = vmul.f32 %v693_v43, %v3169_v1 }
 0x2c2   : > { %v702_v50 = vadd.f32 %v701_v45, %v695_v46 }
 0x2c3   : > { %v706_v47 = vpop.permute.xlu1 %705 }
 0x2c4   : > { %v708_v48 = vmul.f32 %v706_v47, %v3171_v2 }
 0x2c6   : > { %v709_v53 = vadd.f32 %v708_v48, %v702_v50 }
 0x2c7   : > { %v713_v52 = vpop.permute.xlu1 %712 }
 0x2c8   : > { %v715_v54 = vmul.f32 %v713_v52, %v3179_v6 }
 0x2ca   : > { %v716_v55 = vadd.f32 %v715_v54, %v709_v53 }
 0x2cc   : > { %v825_v56 = vsel %vm454_vm1, %v716_v55, 0.0 }
 0x2cd   : > { %826 = vadd.xlane.f32.xlu1 %v825_v56 }
 0x35a   : > { %v827_v57 = vpop.xlane.xlu1 %826 }
 0x35b   : > { %v828_v58 = vmul.f32 0.03125, %v827_v57 }
 0x35d   : > { %v829_v59 = vsub.f32 %v716_v55, %v828_v58 }
 0x35f   : > { %v830_v60 = vmul.f32 %v829_v59, %v829_v59 }
 0x361   : > { %v831_v61 = vsel %vm454_vm1, %v830_v60, 0.0 }
 0x362   : > { %832 = vadd.xlane.f32.xlu0 %v831_v61 }
 0x3ef   : > { %v833_v17 = vpop.xlane.xlu0 %832 }
 0x3f0   : > { %v834_v18 = vmul.f32 0.03125, %v833_v17 }
 0x3f2   : > { %v835_v19 = vadd.f32 1e-05, %v834_v18 }
 0x3f4   : > { %2938 = vrsqrt.f32 %v835_v19 }
 0x3fe   : > { %v2939_v29 = vpop.eup %2938 }
 0x3ff   : > { %v837_v37 = vmul.f32 %v2939_v29, %v829_v59 }
 0x401   : > { %v842_v42 = vmul.f32 %v841_v26, %v837_v37 }
 0x403   : > { %v847_v43 = vadd.f32 %v846_v36, %v842_v42 }
 0x405   : > { %2559 = vmatmul.mubr.msk.f32.vlgmr.msra.gmra.mrb[4].mxu0 %vm454_vm1, %v847_v43 }
 0x406   : > { %2663 = vmatprep.mubr.msk.f32.mxu0 %vm3024_vm2, %v3023_v16 }
 0x4d8   : > { %v917_v45 = vpop.f32.mrb[4].mxu0 }
 0x4d9   : > { %925 = vrot.lane.b32.xlu0 %v917_v45, %s3025_s1  ;;  %923 = vrot.lane.b32.xlu1 %v917_v45, %s3026_s11  ;;  %v3302_v46 = vpop.f32.mrb[5].mxu0 }
 0x4dd   : > { %927 = vrot.lane.b32.xlu1 %v917_v45, %s3027_s14 }
 0x4e1   : > { %939 = vrot.lane.b32.xlu1 %v917_v45, %s3028_s17 }
 0x54b   : > { %v924_v47 = vpop.permute.xlu1 %923  ;;  %v926_v48 = vpop.permute.xlu0 %925 }
 0x54c   : > { %1016 = vrot.lane.b32.xlu1 %v924_v47, %s3028_s17 }
 0x54f   : > { %v928_v50 = vpop.permute.xlu1 %927 }
 0x550   : > { %1092 = vrot.lane.b32.xlu1 %v926_v48, %s3028_s17 }
 0x553   : > { %v940_v52 = vpop.permute.xlu1 %939 }
 0x554   : > { %1168 = vrot.lane.b32.xlu1 %v928_v50, %s3028_s17  ;;  %2657 = vmatpush3.xpose.msk.msra.mxu1 %vm941_vm3, %v940_v52 }
 0x555   : > { %2666 = vmatprep.subr.mxu1 %v3023_v16 }
 0x557   : > { %2659 = vmatmul.mubr.msk.f32.vlgmr.msra.gmra.mrb[0].mxu1 %vm941_vm3, %v917_v45 }
 0x558   : > { %2668 = vmatprep.mubr.msk.f32.mxu1 %vm3024_vm2, %v3023_v16 }
 0x5be   : > { %v1017_v53 = vpop.permute.xlu1 %1016 }
 0x5bf   : > { %2662 = vmatpush3.xpose.msk.msra.mxu0 %vm941_vm3, %v1017_v53 }
 0x5c0   : > { %2671 = vmatprep.subr.mxu0 %v3023_v16 }
 0x5c2   : > { %2664 = vmatmul.mubr.msk.f32.vlgmr.msra.gmra.mrb[6].mxu0 %vm941_vm3, %v924_v47  ;;  %v1093_v54 = vpop.permute.xlu1 %1092 }
 0x5c3   : > { %2667 = vmatpush3.xpose.msk.msra.mxu1 %vm941_vm3, %v1093_v54  ;;  %2673 = vmatprep.mubr.msk.f32.mxu0 %vm3024_vm2, %v3023_v16 }
 0x5c4   : > { %2676 = vmatprep.subr.mxu1 %v3023_v16 }
 0x5c6   : > { %2669 = vmatmul.mubr.msk.f32.vlgmr.msra.gmra.mrb[2].mxu1 %vm941_vm3, %v926_v48  ;;  %v1169_v55 = vpop.permute.xlu1 %1168 }
 0x5c7   : > { %2672 = vmatpush3.xpose.msk.msra.mxu0 %vm941_vm3, %v1169_v55  ;;  %2677 = vmatpush3.msra.mxu1 %v3302_v46 }
 0x5c8   : > { %2681 = vmatprep.subr.mxu0 %v3023_v16  ;;  %2678 = vmatprep.mubr.msk.f32.mxu1 %vm3024_vm2, %v3023_v16 }
 0x5c9   : > { %2686 = vmatprep.subr.mxu1 %v3023_v16 }
 0x5ca   : > { %2674 = vmatmul.mubr.msk.f32.vlgmr.msra.gmra.mrb[8].mxu0 %vm941_vm3, %v928_v50 }
 0x5cb   : > { %2683 = vmatprep.mubr.msk.f32.mxu0 %vm3024_vm2, %v3023_v16 }
 0x62a   : > { %v1012_v56 = vpop.f32.mrb[0].mxu1 }
 0x62b   : > { %v1244_v57 = vmul.f32 0.25, %v1012_v56  ;;  %v2660_v58 = vpop.f32.mrb[1].mxu1 }
 0x62d   : > { %v1249_v59 = vsel %vm1248_vm4, %v1244_v57, -inf }
 0x62e   : > { %1250 = vmax.xlane.f32.xlu0 %v1249_v59 }
 0x695   : > { %v1088_v60 = vpop.f32.mrb[6].mxu0 }
 0x696   : > { %v1245_v61 = vmul.f32 0.25, %v1088_v60  ;;  %v2665_v62 = vpop.f32.mrb[7].mxu0 }
 0x698   : > { %v1252_v63 = vsel %vm1248_vm4, %v1245_v61, -inf }
 0x699   : > { %v1164_v0 = vpop.f32.mrb[2].mxu1  ;;  %1253 = vmax.xlane.f32.xlu1 %v1252_v63 }
 0x69a   : > { %v1246_v4 = vmul.f32 0.25, %v1164_v0  ;;  %v2670_v5 = vpop.f32.mrb[3].mxu1 }
 0x69c   : > { %v1255_v7 = vsel %vm1248_vm4, %v1246_v4, -inf }
 0x69d   : > { %1256 = vmax.xlane.f32.xlu0 %v1255_v7  ;;  %v1240_v8 = vpop.f32.mrb[8].mxu0 }
 0x69e   : > { %v1247_v11 = vmul.f32 0.25, %v1240_v8  ;;  %v2675_v12 = vpop.f32.mrb[9].mxu0 }
 0x6a0   : > { %v1258_v13 = vsel %vm1248_vm4, %v1247_v11, -inf }
 0x6a1   : > { %1259 = vmax.xlane.f32.xlu0 %v1258_v13 }
 0x6aa   : > { %930 = vrot.lane.b32.xlu1 %v3302_v46, %s3026_s11 }
 0x6bb   : > { %v1251_v14 = vpop.xlane.xlu0 %1250 }
 0x6bc   : > { %v1261_v15 = vsub.f32 %v1244_v57, %v1251_v14  ;;  %v817_v14 = vld [vmem:[%s3151_s16] sm:$0xff] }
 0x6be   : > { %v1265_v17 = vmul.f32 1.442695, %v1261_v15  ;;  %v818_v15 = vld [vmem:[%s3151_s16 + $0x8] sm:$0xff] }
 0x6c0   : > { %2940 = vpow2.f32 %v1265_v17  ;;  %v819_v17 = vld [vmem:[%s3151_s16 + $0x10] sm:$0xff] }
 0x6ca   : > { %v2941_v18 = vpop.eup %2940 }
 0x6cb   : > { %v1273_v19 = vsel %vm1248_vm4, %v2941_v18, 0.0 }
 0x6ce   : > { %1274 = vadd.xlane.f32.xlu1 %v1273_v19  ;;  %v820_v19 = vld [vmem:[%s3151_s16 + $0x18] sm:$0xff] }
 0x726   : > { %v1254_v22 = vpop.xlane.xlu1 %1253 }
 0x727   : > { %v1262_v25 = vsub.f32 %v1245_v61, %v1254_v22  ;;  %v821_v22 = vld [vmem:[%s3151_s16 + $0x20] sm:$0xff] }
 0x729   : > { %v1267_v26 = vmul.f32 1.442695, %v1262_v25  ;;  %v822_v25 = vld [vmem:[%s3151_s16 + $0x28] sm:$0xff] }
 0x72a   : > { %v1257_v29 = vpop.xlane.xlu0 %1256  ;;  %v931_v36 = vpop.permute.xlu1 %930 }
 0x72b   : > { %2942 = vpow2.f32 %v1267_v26  ;;  %v1263_v37 = vsub.f32 %v1246_v4, %v1257_v29  ;;  %2682 = vmatpush3.msra.mxu0 %v931_v36  ;;  %v2782_v26 = vpack.c.bf16 %v822_v25, %v821_v22  ;;  %v823_v29 = vld [vmem:[%s3151_s16 + $0x30] sm:$0xff]  ;;  %v824_v36 = vld [vmem:[%s3151_s16 + $0x38] sm:$0xff] }
 0x72c   : > { %2691 = vmatprep.subr.mxu0 %v3023_v16 }
 0x72d   : > { %v1269_v42 = vmul.f32 1.442695, %v1263_v37  ;;  %v2785_v37 = vpack.c.bf16 %v824_v36, %v823_v29 }
 0x72e   : > { %v1260_v43 = vpop.xlane.xlu0 %1259 }
 0x72f   : > { %2944 = vpow2.f32 %v1269_v42  ;;  %v1264_v45 = vsub.f32 %v1247_v11, %v1260_v43  ;;  %v3029_v11 = vmov 1  }
 0x730   : > { %2891 = vset.pattern.permute.xlu0 %v3029_v11  ;;  %2890 = vset.pattern.permute.xlu1 %v3029_v11 }
 0x731   : > { %v1271_v47 = vmul.f32 1.442695, %v1264_v45 }
 0x733   : > { %2946 = vpow2.f32 %v1271_v47 }
 0x735   : > { %v2943_v48 = vpop.eup %2942 }
 0x736   : > { %v1276_v50 = vsel %vm1248_vm4, %v2943_v48, 0.0 }
 0x737   : > { %1277 = vadd.xlane.f32.xlu0 %v1276_v50 }
 0x739   : > { %v2945_v52 = vpop.eup %2944 }
 0x73a   : > { %v1279_v53 = vsel %vm1248_vm4, %v2945_v52, 0.0 }
 0x73b   : > { %1280 = vadd.xlane.f32.xlu1 %v1279_v53  ;;  %v3035_v53 = vmov 2  }
 0x73d   : > { %v2947_v54 = vpop.eup %2946 }
 0x73e   : > { %v1282_v55 = vsel %vm1248_vm4, %v2947_v54, 0.0 }
 0x73f   : > { %1283 = vadd.xlane.f32.xlu0 %v1282_v55  ;;  %v3037_v55 = vmov 3  }
 0x74c   : > { %936 = vrot.lane.b32.xlu1 %v3302_v46, %s3027_s14 }
 0x755   : > { %933 = vrot.lane.b32.xlu0 %v3302_v46, %s3025_s1 }
 0x75b   : > { %v1275_v56 = vpop.xlane.xlu1 %1274 }
 0x75c   : > { %2948 = vrcp.f32 %v1275_v56  ;;  %v3038_v56 = vmov 5  }
 0x766   : > { %v2949_v57 = vpop.eup %2948 }
 0x767   : > { %v1286_v58 = vmul.f32 %v2949_v57, %v2941_v18  ;;  %v3030_v18 = vmov 0.0|0.0  }
 0x769   : > { %2679 = vmatmul.mubr.msk.f32.vlgmr.msra.gmra.mrb[4].mxu1 %vm1248_vm4, %v1286_v58 }
 0x76a   : > { %2688 = vmatprep.mubr.msk.f32.mxu1 %vm3024_vm2, %v3023_v16 }
 0x7c4   : > { %v1278_v59 = vpop.xlane.xlu0 %1277 }
 0x7c5   : > { %2950 = vrcp.f32 %v1278_v59 }
 0x7c8   : > { %v1281_v60 = vpop.xlane.xlu1 %1280 }
 0x7c9   : > { %2952 = vrcp.f32 %v1281_v60 }
 0x7cc   : > { %v1284_v61 = vpop.xlane.xlu0 %1283  ;;  %v937_v46 = vpop.permute.xlu1 %936 }
 0x7cd   : > { %2954 = vrcp.f32 %v1284_v61 }
 0x7cf   : > { %v2951_v62 = vpop.eup %2950 }
 0x7d0   : > { %v1288_v63 = vmul.f32 %v2951_v62, %v2943_v48  ;;  %v934_v0 = vpop.permute.xlu0 %933  ;;  %v3374_v48 = vrot.slane %v3206_v35, %v3213_v49 }
 0x7d1   : > { %2687 = vmatpush3.msra.mxu1 %v934_v0 }
 0x7d2   : > { %2684 = vmatmul.mubr.msk.f32.vlgmr.msra.gmra.mrb[10].mxu0 %vm1248_vm4, %v1288_v63  ;;  %2775 = vmatprep.subr.bf16.mxu1 %v3030_v18 }
 0x7d3   : > { %v2953_v4 = vpop.eup %2952  ;;  %2692 = vmatpush3.msra.mxu0 %v937_v46  ;;  %2693 = vmatprep.mubr.msk.f32.mxu0 %vm3024_vm2, %v3023_v16 }
 0x7d4   : > { %v1290_v5 = vmul.f32 %v2953_v4, %v2945_v52  ;;  %2788 = vmatprep.subr.bf16.mxu0 %v3196_v32 }
 0x7d6   : > { %2689 = vmatmul.mubr.msk.f32.vlgmr.msra.gmra.mrb[6].mxu1 %vm1248_vm4, %v1290_v5 }
 0x7d7   : > { %v2955_v7 = vpop.eup %2954  ;;  %2712 = vmatprep.mubr.msk.f32.mxu1 %vm3024_vm2, %v3023_v16 }
 0x7d8   : > { %v1292_v8 = vmul.f32 %v2955_v7, %v2947_v54  ;;  %v3036_v54 = vmov 4  }
 0x7da   : > { %2694 = vmatmul.mubr.msk.f32.vlgmr.msra.gmra.mrb[12].mxu0 %vm1248_vm4, %v1292_v8 }
 0x7db   : > { %2790 = vmatpush3.bf16.msra.mxu0 %v3196_v32  ;;  %v2776_v32 = vpack.c.bf16 %v818_v15, %v817_v14 }
 0x7dc   : > { %2792 = vmatprep.subr.bf16.mxu0 %v3199_v34 }
 0x7dd   : > { %2777 = vmatpush3.bf16.msra.mxu1 %v2776_v32 }
 0x7de   : > { %2778 = vmatprep.subr.bf16.mxu1 %v3030_v18 }
 0x7df   : > { %2794 = vmatpush3.bf16.msra.mxu0 %v3199_v34  ;;  %v2779_v34 = vpack.c.bf16 %v820_v19, %v819_v17 }
 0x7e0   : > { %2795 = vmatprep.subr.bf16.mxu0 %v3030_v18 }
 0x7e1   : > { %2780 = vmatpush3.bf16.msra.mxu1 %v2779_v34 }
 0x7e2   : > { %2781 = vmatprep.subr.bf16.mxu1 %v3030_v18 }
 0x7e5   : > { %2783 = vmatpush3.bf16.msra.mxu1 %v2782_v26 }
 0x7e6   : > { %2784 = vmatprep.subr.bf16.mxu1 %v3030_v18 }
 0x7e9   : > { %2786 = vmatpush3.bf16.msra.mxu1 %v2785_v37 }
 0x7ea   : > { %2801 = vmatprep.subr.bf16.mxu1 %v3030_v18 }
 0x83c   : > { %v3356_v12 = vpop.f32.mrb[4].mxu1 }
 0x83d   : > { %v2680_v13 = vpop.f32.mrb[5].mxu1 }
 0x8a5   : > { %v1435_v42 = vpop.f32.mrb[10].mxu0 }
 0x8a6   : > { %1586 = vrot.lane.b32.xlu1 %v1435_v42, %s3031_s19  ;;  %v2685_v43 = vpop.f32.mrb[11].mxu0 }
 0x8a9   : > { %v1508_v45 = vpop.f32.mrb[6].mxu1 }
 0x8aa   : > { %1590 = vrot.lane.b32.xlu0 %v1508_v45, %s3032_s20  ;;  %v2690_v47 = vpop.f32.mrb[7].mxu1 }
 0x8ad   : > { %v1581_v50 = vpop.f32.mrb[12].mxu0 }
 0x8ae   : > { %679 = vrot.lane.b32.xlu0 %v3374_v48, %s3033_s26  ;;  %1594 = vrot.lane.b32.xlu1 %v1581_v50, %s3034_s28  ;;  %v2695_v52 = vpop.f32.mrb[13].mxu0 }
 0x8b2   : > { %723 = vperm.xlu0 %2891, %v3247_v27   ;;  %718 = vperm.xlu1 %2890, %v3255_v31  }
 0x8b6   : > { %729 = vperm.xlu0 %2891, %v3267_v40   ;;  %2892 = vset.pattern.permute.xlu1 %v3035_v53 }
 0x8b7   : > { %741 = vperm.xlu1 %2892, %v3255_v31  }
 0x8ba   : > { %735 = vperm.xlu0 %2891, %v3271_v41  }
 0x8bb   : > { %746 = vperm.xlu1 %2892, %v3247_v27  }
 0x8be   : > { %2896 = vset.pattern.permute.xlu0 %v3036_v54 }
 0x8bf   : > { %792 = vperm.xlu0 %2896, %v3247_v27   ;;  %752 = vperm.xlu1 %2892, %v3267_v40  }
 0x8c3   : > { %798 = vperm.xlu0 %2896, %v3267_v40   ;;  %2893 = vset.pattern.permute.xlu1 %v3037_v55 }
 0x8c4   : > { %764 = vperm.xlu1 %2893, %v3255_v31  }
 0x8c7   : > { %2899 = vset.pattern.permute.xlu0 %v3037_v55 }
 0x8c8   : > { %769 = vperm.xlu0 %2899, %v3247_v27   ;;  %2894 = vset.pattern.permute.xlu1 %v3035_v53 }
 0x8c9   : > { %758 = vperm.xlu1 %2894, %v3271_v41  }
 0x8cc   : > { %781 = vperm.xlu0 %2899, %v3271_v41  }
 0x8cd   : > { %2895 = vset.pattern.permute.xlu1 %v3036_v54 }
 0x8ce   : > { %787 = vperm.xlu1 %2895, %v3255_v31  }
 0x8d0   : > { %2902 = vset.pattern.permute.xlu0 %v3038_v56 }
 0x8d2   : > { %2897 = vset.pattern.permute.xlu1 %v3037_v55 }
 0x8d3   : > { %775 = vperm.xlu1 %2897, %v3267_v40  }
 0x8d7   : > { %2898 = vset.pattern.permute.xlu1 %v3038_v56 }
 0x918   : > { %v1587_v57 = vpop.permute.xlu1 %1586 }
 0x919   : > { %v1597_v27 = vsel %vm941_vm3, %v3356_v12, %v1587_v57 }
 0x91c   : > { %v1591_v58 = vpop.permute.xlu0 %1590 }
 0x91d   : > { %v1598_v61 = vsel %vm454_vm1, %v1597_v27, %v1591_v58 }
 0x920   : > { %v680_v59 = vpop.permute.xlu0 %679  ;;  %v1595_v60 = vpop.permute.xlu1 %1594 }
 0x921   : > { %v682_v62 = vmul.f32 %v3242_v24, %v680_v59  ;;  %v685_v31 = vmul.f32 %v3249_v28, %v680_v59  ;;  %v1600_v63 = vsel %vm1599_vm5, %v1598_v61, %v1595_v60  ;;  %v683_v0 = vmul.f32 %v3237_v21, %v680_v59 }
 0x922   : > { %2713 = vmatmul.mubr.msk.f32.vlgmr.msra.gmra.mrb[8].mxu1 %vm1601_vm6, %v1600_v63  ;;  %v684_v24 = vmul.f32 %v3257_v33, %v680_v59 }
 0x923   : > { %v689_v40 = vadd.f32 %v685_v31, %v3264_v39  ;;  %v686_v46 = vadd.f32 %v682_v62, %v3240_v23  ;;  %2756 = vmatprep.mubr.msk.f32.mxu1 %vm3024_vm2, %v3023_v16  ;;  %v687_v4 = vadd.f32 %v683_v0, %v3235_v20 }
 0x924   : > { %v688_v21 = vadd.f32 %v684_v24, %v3252_v30 }
 0x925   : > { %1692 = vperm.xlu0 %2902, %v689_v40   ;;  %1677 = vperm.xlu1 %2898, %v686_v46  }
 0x929   : > { %1682 = vperm.xlu1 %2898, %v687_v4  }
 0x92d   : > { %2900 = vset.pattern.permute.xlu1 %v3036_v54 }
 0x92e   : > { %804 = vperm.xlu1 %2900, %v3271_v41  }
 0x931   : > { %v719_v28 = vpop.permute.xlu1 %718  ;;  %v724_v7 = vpop.permute.xlu0 %723 }
 0x932   : > { %2901 = vset.pattern.permute.xlu1 %v3038_v56  ;;  %v726_v30 = vmul.f32 %v724_v7, %v3173_v3  ;;  %v721_v19 = vmul.f32 %v719_v28, %v3169_v1 }
 0x933   : > { %1687 = vperm.xlu1 %2901, %v688_v21  }
 0x934   : > { %v727_v43 = vadd.f32 %v726_v30, %v721_v19 }
 0x935   : > { %v730_v11 = vpop.permute.xlu0 %729 }
 0x936   : > { %v742_v39 = vpop.permute.xlu1 %741  ;;  %v732_v26 = vmul.f32 %v730_v11, %v3171_v2 }
 0x937   : > { %v744_v29 = vmul.f32 %v742_v39, %v3169_v1 }
 0x938   : > { %v733_v57 = vadd.f32 %v732_v26, %v727_v43 }
 0x939   : > { %v736_v13 = vpop.permute.xlu0 %735 }
 0x93a   : > { %v747_v23 = vpop.permute.xlu1 %746  ;;  %v738_v52 = vmul.f32 %v736_v13, %v3179_v6 }
 0x93b   : > { %v749_v34 = vmul.f32 %v747_v23, %v3173_v3 }
 0x93c   : > { %v739_v61 = vadd.f32 %v738_v52, %v733_v57 }
 0x93d   : > { %v750_v53 = vadd.f32 %v749_v34, %v744_v29 }
 0x93e   : > { %v753_v5 = vpop.permute.xlu1 %752  ;;  %v793_v14 = vpop.permute.xlu0 %792 }
 0x93f   : > { %v795_v36 = vmul.f32 %v793_v14, %v3173_v3  ;;  %v755_v37 = vmul.f32 %v753_v5, %v3171_v2 }
 0x941   : > { %v756_v58 = vadd.f32 %v755_v37, %v750_v53 }
 0x942   : > { %v799_v17 = vpop.permute.xlu0 %798 }
 0x943   : > { %v765_v8 = vpop.permute.xlu1 %764 }
 0x944   : > { %v767_v45 = vmul.f32 %v765_v8, %v3169_v1 }
 0x947   : > { %v770_v41 = vpop.permute.xlu0 %769 }
 0x948   : > { %v759_v12 = vpop.permute.xlu1 %758  ;;  %v772_v25 = vmul.f32 %v770_v41, %v3173_v3  ;;  %v801_v3 = vmul.f32 %v799_v17, %v3171_v2 }
 0x949   : > { %v761_v54 = vmul.f32 %v759_v12, %v3179_v6 }
 0x94a   : > { %v773_v56 = vadd.f32 %v772_v25, %v767_v45 }
 0x94b   : > { %v782_v47 = vpop.permute.xlu0 %781 }
 0x94c   : > { %v784_v62 = vmul.f32 %v782_v47, %v3179_v6  ;;  %v1873_v47 = vcombine.high %v3228_v10, %v3228_v10 }
 0x94d   : > { %v788_v20 = vpop.permute.xlu1 %787 }
 0x94e   : > { %v790_v22 = vmul.f32 %v788_v20, %v3169_v1  ;;  %v762_v1 = vadd.f32 %v761_v54, %v756_v58 }
 0x950   : > { %v796_v55 = vadd.f32 %v795_v36, %v790_v22 }
 0x952   : > { %v776_v15 = vpop.permute.xlu1 %775  ;;  %v802_v31 = vadd.f32 %v801_v3, %v796_v55 }
 0x953   : > { %v778_v50 = vmul.f32 %v776_v15, %v3171_v2 }
 0x955   : > { %v779_v27 = vadd.f32 %v778_v50, %v773_v56  ;;  %v1880_v50 = vrot.slane %v1873_v47, %v3225_v9 }
 0x957   : > { %v785_v28 = vadd.f32 %v784_v62, %v779_v27  ;;  %v1888_v52 = vrot.slane %v1880_v50, %v3225_v9  ;;  %v1881_v53 = vcombine.high %v1880_v50, %v1880_v50 }
 0x959   : > { %v1901_v54 = vrot.slane %v1888_v52, %v3213_v49  ;;  %v1895_v55 = vrot.slane %v1881_v53, %v3225_v9  ;;  %v1896_v56 = vcombine.high %v1888_v52, %v1888_v52 }
 0x95b   : > { %v1905_v57 = vrot.slane %v1895_v55, %v3213_v49  ;;  %v1897_v58 = vcombine.high %v1895_v55, %v1895_v55 }
 0x95d   : > { %v1913_v10 = vrot.slane %v1897_v58, %v3213_v49 }
 0x9a4   : > { %v1678_v33 = vpop.permute.xlu1 %1677  ;;  %v1693_v59 = vpop.permute.xlu0 %1692 }
 0x9a8   : > { %v1683_v32 = vpop.permute.xlu1 %1682 }
 0x9ad   : > { %v805_v42 = vpop.permute.xlu1 %804 }
 0x9ae   : > { %v807_v60 = vmul.f32 %v805_v42, %v3179_v6 }
 0x9b0   : > { %v808_v39 = vadd.f32 %v807_v60, %v802_v31 }
 0x9b2   : > { %v1688_v63 = vpop.permute.xlu1 %1687 }
 0x9f5   : > { %v1671_v0 = vpop.f32.mrb[8].mxu1 }
 0x9f6   : > { %v1695_v40 = vmul.f32 %v1678_v33, %v1671_v0  ;;  %v1696_v46 = vmul.f32 %v1683_v32, %v1671_v0  ;;  %v1697_v4 = vmul.f32 %v1688_v63, %v1671_v0  ;;  %v1698_v24 = vmul.f32 %v1693_v59, %v1671_v0  ;;  %v2714_v21 = vpop.f32.mrb[9].mxu1 }
 0x9f8   : > { %v3423_v23 = vadd.f32 %v1695_v40, %v739_v61  ;;  %v3425_v2 = vadd.f32 %v1696_v46, %v762_v1  ;;  %v3427_v5 = vadd.f32 %v1697_v4, %v785_v28  ;;  %v3429_v7 = vadd.f32 %v1698_v24, %v808_v39 }
 0x9f9   : > { %v1757_v4 = vsub.s32 1, %v3210_v44 }
 0x9fa   : > { %v1703_v6 = vsel %vm454_vm1, %v3423_v23, 0.0  ;;  %v1706_v8 = vsel %vm454_vm1, %v3425_v2, 0.0  ;;  %v1712_v11 = vsel %vm454_vm1, %v3429_v7, 0.0  ;;  %v1709_v12 = vsel %vm454_vm1, %v3427_v5, 0.0 }
 0x9fb   : > { %1704 = vadd.xlane.f32.xlu1 %v1703_v6  ;;  %1707 = vadd.xlane.f32.xlu0 %v1706_v8  ;;  %v1758_v21 = vrot.slane %v3216_v51, %v1757_v4  ;;  %v3041_v51 = vmov 6  }
 0x9fc   : > { %2903 = vset.pattern.permute.xlu0 %v3041_v51  ;;  %2904 = vset.pattern.permute.xlu1 %v3041_v51 }
 0x9ff   : > { %1713 = vadd.xlane.f32.xlu0 %v1712_v11  ;;  %1710 = vadd.xlane.f32.xlu1 %v1709_v12 }
 0xa88   : > { %v1708_v13 = vpop.xlane.xlu0 %1707  ;;  %v1705_v20 = vpop.xlane.xlu1 %1704 }
 0xa89   : > { %v1716_v14 = vmul.f32 0.03125, %v1708_v13  ;;  %v1715_v15 = vmul.f32 0.03125, %v1705_v20 }
 0xa8b   : > { %v1720_v33 = vsub.f32 %v3425_v2, %v1716_v14  ;;  %v1719_v17 = vsub.f32 %v3423_v23, %v1715_v15 }
 0xa8c   : > { %v1714_v32 = vpop.xlane.xlu0 %1713  ;;  %v1711_v41 = vpop.xlane.xlu1 %1710 }
 0xa8d   : > { %v1718_v30 = vmul.f32 0.03125, %v1714_v32  ;;  %v1717_v19 = vmul.f32 0.03125, %v1711_v41  ;;  %v1724_v34 = vmul.f32 %v1720_v33, %v1720_v33  ;;  %v1723_v22 = vmul.f32 %v1719_v17, %v1719_v17 }
 0xa8f   : > { %v1722_v25 = vsub.f32 %v3429_v7, %v1718_v30  ;;  %v1721_v26 = vsub.f32 %v3427_v5, %v1717_v19  ;;  %v1730_v29 = vsel %vm454_vm1, %v1724_v34, 0.0  ;;  %v1727_v36 = vsel %vm454_vm1, %v1723_v22, 0.0 }
 0xa90   : > { %1731 = vadd.xlane.f32.xlu0 %v1730_v29  ;;  %1728 = vadd.xlane.f32.xlu1 %v1727_v36 }
 0xa91   : > { %v1726_v37 = vmul.f32 %v1722_v25, %v1722_v25  ;;  %v1725_v42 = vmul.f32 %v1721_v26, %v1721_v26 }
 0xa93   : > { %v1736_v43 = vsel %vm454_vm1, %v1726_v37, 0.0  ;;  %v1733_v45 = vsel %vm454_vm1, %v1725_v42, 0.0 }
 0xa94   : > { %1737 = vadd.xlane.f32.xlu0 %v1736_v43  ;;  %1734 = vadd.xlane.f32.xlu1 %v1733_v45 }
 0xaa5   : > { %1864 = vrot.lane.b32.xlu1 %v3206_v35, %s3039_s15  ;;  %v1909_v35 = vrot.slane %v1896_v56, %v3213_v49  ;;  %v3042_v56 = vmov 7  }
 0xaa9   : > { %1916 = vrot.lane.b32.xlu1 %v1905_v57, %s3040_s13 }
 0xaaa   : > { %1914 = vrot.lane.b32.xlu0 %v1901_v54, %s3040_s13 }
 0xaad   : > { %1918 = vrot.lane.b32.xlu1 %v1909_v35, %s3040_s13 }
 0xaae   : > { %1920 = vrot.lane.b32.xlu0 %v1913_v10, %s3040_s13 }
 0xb1d   : > { %v1732_v3 = vpop.xlane.xlu0 %1731  ;;  %v1729_v27 = vpop.xlane.xlu1 %1728 }
 0xb1e   : > { %v1740_v59 = vmul.f32 0.03125, %v1732_v3  ;;  %v1739_v60 = vmul.f32 0.03125, %v1729_v27 }
 0xb20   : > { %v1744_v61 = vadd.f32 1e-05, %v1740_v59  ;;  %v1743_v1 = vadd.f32 1e-05, %v1739_v60 }
 0xb21   : > { %v1738_v62 = vpop.xlane.xlu0 %1737  ;;  %v1735_v31 = vpop.xlane.xlu1 %1734 }
 0xb22   : > { %2956 = vrsqrt.f32 %v1744_v61  ;;  %v1742_v63 = vmul.f32 0.03125, %v1738_v62  ;;  %v1741_v0 = vmul.f32 0.03125, %v1735_v31 }
 0xb23   : > { %2958 = vrsqrt.f32 %v1743_v1 }
 0xb24   : > { %v1746_v40 = vadd.f32 1e-05, %v1742_v63  ;;  %v1745_v46 = vadd.f32 1e-05, %v1741_v0  ;;  %v3044_v63 = vmov 10   ;;  %v3045_v0 = vmov 9  }
 0xb25   : > { %v1865_v24 = vpop.permute.xlu1 %1864  ;;  %v1915_v29 = vpop.permute.xlu0 %1914 }
 0xb26   : > { %2960 = vrsqrt.f32 %v1746_v40  ;;  %2816 = vpush %v1865_v24  ;;  %v3046_v40 = vmov 8  }
 0xb27   : > { %2962 = vrsqrt.f32 %v1745_v46  ;;  %v3047_v46 = vmov 11  }
 0xb29   : > { %v3467_v22 = vpop.permute.xlu1 %1916  ;;  %v1921_v54 = vpop.permute.xlu0 %1920 }
 0xb2c   : > { %v2957_v28 = vpop.eup %2956 }
 0xb2d   : > { %v2959_v39 = vpop.eup %2958  ;;  %v1752_v6 = vmul.f32 %v2957_v28, %v1720_v33  ;;  %v3480_v47 = vpop.permute.xlu1 %1918 }
 0xb2e   : > { %v1751_v8 = vmul.f32 %v2959_v39, %v1719_v17 }
 0xb2f   : > { %v1760_v11 = vmul.f32 %v1758_v21, %v1752_v6 }
 0xb30   : > { %v2961_v12 = vpop.eup %2960  ;;  %v1759_v13 = vmul.f32 %v1758_v21, %v1751_v8 }
 0xb31   : > { %v2963_v20 = vpop.eup %2962  ;;  %v1754_v14 = vmul.f32 %v2961_v12, %v1722_v25 }
 0xb32   : > { %2723 = vmatprep.mubr.msk.f32.mxu0 %vm454_vm1, %v1759_v13  ;;  %v1753_v15 = vmul.f32 %v2963_v20, %v1721_v26  ;;  %v2060_v20 = vld [vmem:[%s3156_s18] sm:$0xff] }
 0xb33   : > { %2724 = vmatmul.mubr.msk.f32.vlgmr.msra.gmra.mrb[14].mxu0 %vm454_vm1, %v1760_v11  ;;  %v1762_v32 = vmul.f32 %v1758_v21, %v1754_v14  ;;  %v2061_v14 = vld [vmem:[%s3156_s18 + $0x8] sm:$0xff] }
 0xb34   : > { %v1761_v41 = vmul.f32 %v1758_v21, %v1753_v15  ;;  %v2796_v15 = vpack.c.bf16 %v2061_v14, %v2060_v20 }
 0xb36   : > { %2726 = vmatprep.mubr.msk.f32.mxu0 %vm454_vm1, %v1761_v41  ;;  %2797 = vmatpush3.bf16.msra.mxu0 %v2796_v15  ;;  %v2063_v41 = vld [vmem:[%s3156_s18 + $0x18] sm:$0xff] }
 0xb37   : > { %2727 = vmatmul.mubr.msk.f32.gmra.mrb[16].mxu0 %vm454_vm1, %v1762_v32  ;;  %2798 = vmatprep.subr.bf16.mxu0 %v3030_v18  ;;  %v2062_v32 = vld [vmem:[%s3156_s18 + $0x10] sm:$0xff]  ;;  %s3048_s18 = smov (!%p2579_p8), 64  }
 0xb38   : > { %2737 = vmatprep.mubr.msk.f32.mxu0 %vm3024_vm2, %v3023_v16  ;;  %v2799_v51 = vpack.c.bf16 %v2063_v41, %v2062_v32 }
 0xb3a   : > { %2800 = vmatpush3.bf16.msra.mxu0 %v2799_v51 }
 0xb57   : > { %s2817_s16 = spop %2816 }
 0xb58   : > { %v1867_v34 = vstv %s2817_s16 }
 0xc06   : > { %v2725_v33 = vpop.f32.mrb[14].mxu0 }
 0xc07   : > { %2964 = vtanh.f32 %v2725_v33  ;;  %v1841_v17 = vpop.f32.mrb[15].mxu0 }
 0xc08   : > { %2966 = vtanh.f32 %v1841_v17 }
 0xc0a   : > { %v2728_v30 = vpop.f32.mrb[16].mxu0 }
 0xc0b   : > { %2968 = vtanh.f32 %v2728_v30  ;;  %v1851_v19 = vpop.f32.mrb[17].mxu0 }
 0xc0c   : > { %2970 = vtanh.f32 %v1851_v19 }
 0xc11   : > { %v3469_v25 = vpop.eup %2964 }
 0xc12   : > { %v2967_v26 = vpop.eup %2966  ;;  %v1870_v16 = vmul.f32 %v3469_v25, %v1867_v34 }
 0xc13   : > { %v1869_v36 = vmul.f32 %v2967_v26, %v1867_v34 }
 0xc14   : > { %v3473_v37 = vadd.f32 %v3467_v22, %v1870_v16  ;;  %v2092_v16 = vsub.s32 5, %v3210_v44 }
 0xc15   : > { %v2969_v42 = vpop.eup %2968  ;;  %v3475_v43 = vadd.f32 %v1915_v29, %v1869_v36  ;;  %v3530_v36 = vld [vmem:[%s3136_s23] sm:$0xff] }
 0xc16   : > { %v3477_v45 = vpop.eup %2970  ;;  %1949 = vperm.xlu0 %2903, %v3473_v37   ;;  %v1872_v52 = vmul.f32 %v2969_v42, %v1867_v34 }
 0xc17   : > { %1943 = vperm.xlu1 %2904, %v3475_v43   ;;  %v1871_v50 = vmul.f32 %v3477_v45, %v1867_v34 }
 0xc18   : > { %v3488_v55 = vadd.f32 %v1921_v54, %v1872_v52  ;;  %v2065_v52 = vld [vmem:[%s3161_s24 + $0x8] sm:$0xff] }
 0xc19   : > { %v3485_v53 = vadd.f32 %v3480_v47, %v1871_v50  ;;  %v2064_v50 = vld [vmem:[%s3161_s24] sm:$0xff] }
 0xc1a   : > { %2906 = vset.pattern.permute.xlu0 %v3042_v56 }
 0xc1b   : > { %1956 = vperm.xlu1 %2904, %v3485_v53  }
 0xc1f   : > { %1963 = vperm.xlu1 %2904, %v3488_v55  }
 0xc23   : > { %2905 = vset.pattern.permute.xlu1 %v3042_v56 }
 0xc95   : > { %v1950_v57 = vpop.permute.xlu0 %1949 }
 0xc96   : > { %v1944_v58 = vpop.permute.xlu1 %1943  ;;  %v1952_v10 = vmul.f32 %v1950_v57, %v3425_v2  ;;  %v2068_v57 = vld [vmem:[%s3161_s24 + $0x20] sm:$0xff] }
 0xc97   : > { %v1946_v35 = vmul.f32 %v1944_v58, %v3423_v23  ;;  %v2069_v58 = vld [vmem:[%s3161_s24 + $0x28] sm:$0xff] }
 0xc99   : > { %v1953_v59 = vadd.f32 %v1952_v10, %v1946_v35  ;;  %v2808_v10 = vpack.c.bf16 %v2069_v58, %v2068_v57  ;;  %v2070_v35 = vld [vmem:[%s3161_s24 + $0x30] sm:$0xff] }
 0xc9a   : > { %v1957_v3 = vpop.permute.xlu1 %1956 }
 0xc9b   : > { %v1959_v27 = vmul.f32 %v1957_v3, %v3427_v5  ;;  %v2071_v3 = vld [vmem:[%s3161_s24 + $0x38] sm:$0xff] }
 0xc9d   : > { %v1960_v61 = vadd.f32 %v1959_v27, %v1953_v59  ;;  %v2811_v27 = vpack.c.bf16 %v2071_v3, %v2070_v35  ;;  %v2097_v59 = vsub.s32 6, %v3210_v44 }
 0xc9e   : > { %v1964_v60 = vpop.permute.xlu1 %1963 }
 0xc9f   : > { %v1966_v1 = vmul.f32 %v1964_v60, %v3429_v7  ;;  %v2098_v60 = vrot.slane %v3530_v36, %v2097_v59 }
 0xca1   : > { %v1967_v62 = vadd.f32 %v1966_v1, %v1960_v61 }
 0xca3   : > { %v2072_v31 = vsel %vm454_vm1, %v1967_v62, 0.0 }
 0xca4   : > { %2073 = vadd.xlane.f32.xlu0 %v2072_v31 }
 0xcba   : > { %1930 = vrot.lane.b32.xlu0 %v3374_v48, %s3043_s12 }
 0xcbe   : > { %1974 = vperm.xlu0 %2906, %v3473_v37  }
 0xcc2   : > { %2910 = vset.pattern.permute.xlu0 %v3044_v63 }
 0xcc3   : > { %2043 = vperm.xlu0 %2910, %v3473_v37  }
 0xcc7   : > { %2911 = vset.pattern.permute.xlu0 %v3045_v0 }
 0xcc8   : > { %2015 = vperm.xlu0 %2911, %v3475_v43  }
 0xccc   : > { %2026 = vperm.xlu0 %2911, %v3485_v53  }
 0xcd0   : > { %2916 = vset.pattern.permute.xlu0 %v3046_v40 }
 0xcd1   : > { %2009 = vperm.xlu0 %2916, %v3488_v55  }
 0xcd5   : > { %2919 = vset.pattern.permute.xlu0 %v3047_v46 }
 0xd31   : > { %v2074_v24 = vpop.xlane.xlu0 %2073 }
 0xd32   : > { %v2075_v48 = vmul.f32 0.03125, %v2074_v24 }
 0xd34   : > { %v2076_v21 = vsub.f32 %v1967_v62, %v2075_v48 }
 0xd35   : > { %v1931_v28 = vpop.permute.xlu0 %1930 }
 0xd36   : > { %v1933_v39 = vmul.f32 %v2967_v26, %v1931_v28  ;;  %v2077_v6 = vmul.f32 %v2076_v21, %v2076_v21  ;;  %v1936_v8 = vmul.f32 %v2969_v42, %v1931_v28  ;;  %v1934_v33 = vmul.f32 %v3469_v25, %v1931_v28 }
 0xd37   : > { %v1935_v17 = vmul.f32 %v3477_v45, %v1931_v28  ;;  %v2087_v25 = vsub.s32 4, %v3210_v44  ;;  %v2093_v42 = vrot.slane %v3530_v36, %v2092_v16 }
 0xd38   : > { %v1937_v11 = vadd.f32 %v1933_v39, %v1915_v29  ;;  %v2078_v12 = vsel %vm454_vm1, %v2077_v6, 0.0  ;;  %v1940_v13 = vadd.f32 %v1936_v8, %v1921_v54  ;;  %v1938_v30 = vadd.f32 %v1934_v33, %v3467_v22  ;;  %v2066_v54 = vld [vmem:[%s3161_s24 + $0x10] sm:$0xff] }
 0xd39   : > { %2079 = vadd.xlane.f32.xlu1 %v2078_v12  ;;  %v1939_v19 = vadd.f32 %v1935_v17, %v3480_v47  ;;  %v2088_v22 = vrot.slane %v3530_v36, %v2087_v25 }
 0xd3a   : > { %2278 = vperm.xlu0 %2919, %v1937_v11  }
 0xd3e   : > { %2293 = vperm.xlu0 %2919, %v1940_v13  }
 0xd4a   : > { %1969 = vperm.xlu1 %2905, %v3475_v43  }
 0xd4e   : > { %2907 = vset.pattern.permute.xlu1 %v3046_v40 }
 0xd4f   : > { %1992 = vperm.xlu1 %2907, %v3475_v43  }
 0xd53   : > { %1997 = vperm.xlu1 %2907, %v3473_v37  }
 0xd57   : > { %2908 = vset.pattern.permute.xlu1 %v3045_v0 }
 0xd58   : > { %2020 = vperm.xlu1 %2908, %v3473_v37  }
 0xd5c   : > { %2909 = vset.pattern.permute.xlu1 %v3044_v63 }
 0xd5d   : > { %2038 = vperm.xlu1 %2909, %v3475_v43  }
 0xd61   : > { %2912 = vset.pattern.permute.xlu1 %v3042_v56 }
 0xd62   : > { %1980 = vperm.xlu1 %2912, %v3485_v53  }
 0xd66   : > { %2913 = vset.pattern.permute.xlu1 %v3046_v40 }
 0xd67   : > { %2003 = vperm.xlu1 %2913, %v3485_v53  }
 0xd6b   : > { %2914 = vset.pattern.permute.xlu1 %v3044_v63 }
 0xd6c   : > { %2049 = vperm.xlu1 %2914, %v3485_v53   ;;  %v2802_v53 = vpack.c.bf16 %v2065_v52, %v2064_v50 }
 0xd6e   : > { %2803 = vmatpush3.bf16.msra.mxu1 %v2802_v53 }
 0xd6f   : > { %2804 = vmatprep.subr.bf16.mxu1 %v3030_v18 }
 0xd70   : > { %2915 = vset.pattern.permute.xlu1 %v3042_v56 }
 0xd71   : > { %1986 = vperm.xlu1 %2915, %v3488_v55  }
 0xd75   : > { %2917 = vset.pattern.permute.xlu1 %v3045_v0 }
 0xd76   : > { %2032 = vperm.xlu1 %2917, %v3488_v55  }
 0xd7a   : > { %2918 = vset.pattern.permute.xlu1 %v3044_v63 }
 0xd7b   : > { %2055 = vperm.xlu1 %2918, %v3488_v55   ;;  %v2067_v55 = vld [vmem:[%s3161_s24 + $0x18] sm:$0xff] }
 0xd7c   : > { %v2805_v56 = vpack.c.bf16 %v2067_v55, %v2066_v54 }
 0xd7e   : > { %2806 = vmatpush3.bf16.msra.mxu1 %v2805_v56 }
 0xd7f   : > { %2920 = vset.pattern.permute.xlu1 %v3047_v46  ;;  %2807 = vmatprep.subr.bf16.mxu1 %v3030_v18 }
 0xd80   : > { %2283 = vperm.xlu1 %2920, %v1938_v30  }
 0xd82   : > { %2809 = vmatpush3.bf16.msra.mxu1 %v2808_v10  ;;  %v2201_v10 = vsub.s32 7, %v3210_v44 }
 0xd83   : > { %2810 = vmatprep.subr.bf16.mxu1 %v3030_v18 }
 0xd84   : > { %2288 = vperm.xlu1 %2920, %v1939_v19  }
 0xd86   : > { %2812 = vmatpush3.bf16.msra.mxu1 %v2811_v27 }
 0xdc6   : > { %v2080_v34 = vpop.xlane.xlu1 %2079 }
 0xdc7   : > { %v2081_v26 = vmul.f32 0.03125, %v2080_v34 }
 0xdc9   : > { %v2082_v29 = vadd.f32 1e-05, %v2081_v26 }
 0xdca   : > { %v1970_v19 = vpop.permute.xlu1 %1969 }
 0xdcb   : > { %2972 = vrsqrt.f32 %v2082_v29  ;;  %v1972_v57 = vmul.f32 %v1970_v19, %v3423_v23 }
 0xdce   : > { %v1993_v34 = vpop.permute.xlu1 %1992 }
 0xdcf   : > { %v1995_v3 = vmul.f32 %v1993_v34, %v3423_v23 }
 0xdd2   : > { %v1998_v26 = vpop.permute.xlu1 %1997 }
 0xdd3   : > { %v2000_v55 = vmul.f32 %v1998_v26, %v3425_v2 }
 0xdd5   : > { %v2973_v37 = vpop.eup %2972 }
 0xdd6   : > { %v2084_v43 = vmul.f32 %v2973_v37, %v2076_v21  ;;  %v1975_v37 = vpop.permute.xlu0 %1974 }
 0xdd7   : > { %v2021_v29 = vpop.permute.xlu1 %2020  ;;  %v1977_v59 = vmul.f32 %v1975_v37, %v3425_v2 }
 0xdd8   : > { %v2089_v45 = vmul.f32 %v2088_v22, %v2084_v43  ;;  %v2023_v56 = vmul.f32 %v2021_v29, %v3425_v2 }
 0xdda   : > { %v2094_v47 = vadd.f32 %v2093_v42, %v2089_v45  ;;  %v2044_v43 = vpop.permute.xlu0 %2043 }
 0xddc   : > { %2738 = vmatmul.mubr.msk.f32.vlgmr.msra.gmra.mrb[18].mxu0 %vm454_vm1, %v2094_v47  ;;  %v2039_v25 = vpop.permute.xlu1 %2038 }
 0xddd   : > { %v2041_v58 = vmul.f32 %v2039_v25, %v3423_v23 }
 0xdde   : > { %v2016_v47 = vpop.permute.xlu0 %2015 }
 0xddf   : > { %v2018_v35 = vmul.f32 %v2016_v47, %v3423_v23  ;;  %v2202_v23 = vrot.slane %v3530_v36, %v2201_v10 }
 0xde1   : > { %v1981_v16 = vpop.permute.xlu1 %1980 }
 0xde2   : > { %v2027_v52 = vpop.permute.xlu0 %2026 }
 0xde6   : > { %v2004_v22 = vpop.permute.xlu1 %2003  ;;  %v2010_v54 = vpop.permute.xlu0 %2009 }
 0xde7   : > { %v2006_v27 = vmul.f32 %v2004_v22, %v3427_v5 }
 0xdeb   : > { %v2050_v42 = vpop.permute.xlu1 %2049 }
 0xdf0   : > { %v1987_v45 = vpop.permute.xlu1 %1986 }
 0xdf5   : > { %v2033_v50 = vpop.permute.xlu1 %2032 }
 0xdfa   : > { %v2056_v53 = vpop.permute.xlu1 %2055 }
 0xeaf   : > { %v2168_v61 = vpop.f32.mrb[18].mxu0 }
 0xeb0   : > { %v2169_v1 = vadd.f32 %v2168_v61, %v2098_v60  ;;  %v2739_v62 = vpop.f32.mrb[19].mxu0  ;;  %v2046_v60 = vmul.f32 %v2044_v43, %v3425_v2  ;;  %v2279_v61 = vpop.permute.xlu0 %2278  ;;  %v2058_v2 = vmul.f32 %v2056_v53, %v3429_v7 }
 0xeb1   : > { %v2024_v62 = vadd.f32 %v2023_v56, %v2018_v35 }
 0xeb2   : > { %v2173_v31 = vmul.f32 0.70710677, %v2169_v1  ;;  %v2172_v33 = vmul.f32 0.5, %v2169_v1  ;;  %v2001_v1 = vadd.f32 %v2000_v55, %v1995_v3 }
 0xeb4   : > { %v2174_v63 = vand.u32 2147483647, %v2173_v31  ;;  %vm2194_vm7 = vcmp.ge.f32.partialorder %v2173_v31, 0.0  ;;  %v1983_v31 = vmul.f32 %v1981_v16, %v3427_v5 }
 0xeb6   : > { %v2175_v0 = vmul.f32 0.3275911, %v2174_v63  ;;  %v2188_v46 = vsub.f32 0.0, %v2174_v63 }
 0xeb8   : > { %v2176_v40 = vadd.f32 1.0, %v2175_v0  ;;  %v2189_v48 = vmul.f32 %v2188_v46, %v2174_v63  ;;  %v2052_v63 = vmul.f32 %v2050_v42, %v3427_v5  ;;  %v2284_v0 = vpop.permute.xlu1 %2283  ;;  %v1978_v46 = vadd.f32 %v1977_v59, %v1972_v57  ;;  %v2312_v57 = vld [vmem:[%s3614_s7] sm:$0x3] (!%p2579_p8) }
 0xeb9   : > { %v2341_v3 = vrot.slane (!%p2579_p8), %v2312_v57, %v1757_v4 }
 0xeba   : > { %2974 = vrcp.f32 %v2176_v40  ;;  %v2190_v28 = vmul.f32 1.442695, %v2189_v48  ;;  %v2029_v40 = vmul.f32 %v2027_v52, %v3427_v5  ;;  %v2007_v48 = vadd.f32 %v2006_v27, %v2001_v1  ;;  %v2294_v5 = vpop.permute.xlu0 %2293 }
 0xebc   : > { %2976 = vpow2.f32 %v2190_v28  ;;  %v2012_v28 = vmul.f32 %v2010_v54, %v3429_v7 }
 0xec4   : > { %v2975_v24 = vpop.eup %2974 }
 0xec5   : > { %v2179_v18 = vmul.f32 1.0614054, %v2975_v24 }
 0xec6   : > { %v2977_v14 = vpop.eup %2976 }
 0xec7   : > { %v2180_v21 = vadd.f32 -1.4531521, %v2179_v18  ;;  %v1989_v18 = vmul.f32 %v1987_v45, %v3429_v7 }
 0xec9   : > { %v2181_v39 = vmul.f32 %v2975_v24, %v2180_v21  ;;  %v2035_v21 = vmul.f32 %v2033_v50, %v3429_v7 }
 0xecb   : > { %v2182_v6 = vadd.f32 1.4214138, %v2181_v39  ;;  %v1984_v39 = vadd.f32 %v1983_v31, %v1978_v46 }
 0xecd   : > { %v2183_v8 = vmul.f32 %v2975_v24, %v2182_v6 }
 0xecf   : > { %v2184_v11 = vadd.f32 -0.28449672, %v2183_v8  ;;  %v2030_v8 = vadd.f32 %v2029_v40, %v2024_v62 }
 0xed1   : > { %v2185_v12 = vmul.f32 %v2975_v24, %v2184_v11 }
 0xed3   : > { %v2186_v13 = vadd.f32 0.2548296, %v2185_v12 }
 0xed5   : > { %v2187_v20 = vmul.f32 %v2975_v24, %v2186_v13  ;;  %v2047_v24 = vadd.f32 %v2046_v60, %v2041_v58  ;;  %v2336_v58 = vrot.slane (!%p2579_p8), %v2312_v57, %v3213_v49 }
 0xed7   : > { %v2192_v15 = vmul.f32 %v2977_v14, %v2187_v20  ;;  %v2053_v6 = vadd.f32 %v2052_v63, %v2047_v24  ;;  %v2013_v20 = vadd.f32 %v2012_v28, %v2007_v48  ;;  %v1990_v14 = vadd.f32 %v1989_v18, %v1984_v39 }
 0xed9   : > { %v2193_v32 = vsub.f32 1.0, %v2192_v15  ;;  %v2036_v15 = vadd.f32 %v2035_v21, %v2030_v8  ;;  %v2059_v36 = vadd.f32 %v2058_v2, %v2053_v6 }
 0xedb   : > { %v2195_v41 = vsub.f32 0.0, %v2193_v32 }
 0xedd   : > { %v2196_v51 = vsel %vm2194_vm7, %v2193_v32, %v2195_v41  ;;  %v2289_v32 = vpop.permute.xlu1 %2288 }
 0xede   : > { %v2197_v17 = vadd.f32 1.0, %v2196_v51 }
 0xee0   : > { %v2198_v30 = vmul.f32 %v2197_v17, %v2172_v33 }
 0xee2   : > { %2757 = vmatmul.mubr.msk.f32.vlgmr.msra.gmra.mrb[10].mxu1 %vm1601_vm6, %v2198_v30 }
 0xfb5   : > { %v2272_v11 = vpop.f32.mrb[10].mxu1 }
 0xfb6   : > { %v2273_v12 = vadd.f32 %v2272_v11, %v2202_v23  ;;  %v2758_v13 = vpop.f32.mrb[11].mxu1 }
 0xfb7   : > { %2311 = sbr.rel (%p2579_p8) target bundleno = 4489 (0x1189), region = 60 }
 0xfb8   : > { %v2296_v41 = vmul.f32 %v2279_v61, %v2273_v12  ;;  %v2297_v51 = vmul.f32 %v2284_v0, %v2273_v12  ;;  %v2298_v33 = vmul.f32 %v2289_v32, %v2273_v12  ;;  %v2299_v17 = vmul.f32 %v2294_v5, %v2273_v12 }
 0xfba   : > { %v2300_v30 = vadd.f32 %v2296_v41, %v1990_v14  ;;  %v2301_v19 = vadd.f32 %v2297_v51, %v2013_v20  ;;  %v2302_v34 = vadd.f32 %v2298_v33, %v2036_v15  ;;  %v2303_v7 = vadd.f32 %v2299_v17, %v2059_v36 }
 0xfbc   : > { %2304 = vst.msk [vmem:[#allocation2] sm:$0xff] %vm454_vm1, %v2300_v30  ;;  %2305 = vst.msk [vmem:[#allocation2 + $0x8] sm:$0xff] %vm454_vm1, %v2301_v19  ;;  %v2313_v26 = vsel (!%p2579_p8), %vm454_vm1, %v2300_v30, 0.0  ;;  %v2314_v29 = vsel (!%p2579_p8), %vm454_vm1, %v2301_v19, 0.0  ;;  %v2316_v25 = vsel (!%p2579_p8), %vm454_vm1, %v2302_v34, 0.0  ;;  %v2318_v22 = vsel (!%p2579_p8), %vm454_vm1, %v2303_v7, 0.0 }
 0xfbd   : > { %2306 = vst.msk [vmem:[#allocation2 + $0x10] sm:$0xff] %vm454_vm1, %v2302_v34  ;;  %2307 = vst.msk [vmem:[#allocation2 + $0x18] sm:$0xff] %vm454_vm1, %v2303_v7  ;;  %v2315_v16 = vadd.f32 (!%p2579_p8), %v2314_v29, %v2313_v26 }
 0xfbf   : > { %v2317_v37 = vadd.f32 %v2316_v25, %v2315_v16 }
 0xfc1   : > { %v2319_v42 = vadd.f32 %v2318_v22, %v2317_v37 }
 0xfc3   : > { %v2320_v43 = vsel %vm454_vm1, %v2319_v42, 0.0 }
 0xfc4   : > { %2321 = vadd.xlane.f32.xlu0 %v2320_v43 }
0x1051   : > { %v2322_v45 = vpop.xlane.xlu0 %2321 }
0x1052   : > { %v2323_v47 = vmul.f32 0.03125, %v2322_v45 }
0x1054   : > { %v2324_v50 = vsub.f32 %v2319_v42, %v2323_v47 }
0x1056   : > { %v2325_v52 = vmul.f32 %v2324_v50, %v2324_v50 }
0x1058   : > { %v2326_v53 = vsel %vm454_vm1, %v2325_v52, 0.0 }
0x1059   : > { %2327 = vadd.xlane.f32.xlu0 %v2326_v53 }
0x10e6   : > { %v2328_v54 = vpop.xlane.xlu0 %2327 }
0x10e7   : > { %v2329_v55 = vmul.f32 0.03125, %v2328_v54 }
0x10e9   : > { %v2330_v56 = vadd.f32 1e-05, %v2329_v55 }
0x10eb   : > { %2979 = vrsqrt.f32 %v2330_v56 }
0x10f5   : > { %v2980_v10 = vpop.eup %2979 }
0x10f6   : > { %v2332_v35 = vmul.f32 %v2980_v10, %v2324_v50 }
0x10f8   : > { %v2337_v27 = vmul.f32 %v2336_v58, %v2332_v35 }
0x10fa   : > { %v2342_v59 = vadd.f32 %v2341_v3, %v2337_v27 }
0x10fc   : > { %v2348_v60 = vrot.slane %v2342_v59, 2  ;;  %v2344_v61 = vrot.slane %v2342_v59, 1  ;;  %v2358_v1 = vrot.slane %v2342_v59, 5  ;;  %v2362_v62 = vrot.slane %v2342_v59, 6 }
0x10fd   : > { %v2352_v31 = vrot.slane %v2342_v59, 3  ;;  %v2366_v49 = vrot.slane %v2342_v59, 7  ;;  %v2356_v24 = vrot.slane %v2342_v59, 4 }
0x10fe   : > { %2349 = vrot.lane.b32.xlu0 %v2348_v60, %s3048_s18  ;;  %2345 = vrot.lane.b32.xlu1 %v2344_v61, %s3049_s21 }
0x1102   : > { %2359 = vrot.lane.b32.xlu1 %v2358_v1, %s3049_s21 }
0x1106   : > { %2363 = vrot.lane.b32.xlu1 %v2362_v62, %s3048_s18 }
0x110a   : > { %2353 = vrot.lane.b32.xlu1 %v2352_v31, %s3050_s22 }
0x110e   : > { %2367 = vrot.lane.b32.xlu1 %v2366_v49, %s3050_s22 }
0x1170   : > { %v2346_v63 = vpop.permute.xlu1 %2345  ;;  %v2350_v40 = vpop.permute.xlu0 %2349 }
0x1171   : > { %v2370_v46 = vsel %vm454_vm1, %v2342_v59, %v2346_v63 }
0x1172   : > { %v2371_v48 = vsel %vm1601_vm6, %v2370_v46, %v2350_v40 }
0x1174   : > { %v2360_v44 = vpop.permute.xlu1 %2359 }
0x1175   : > { %v2374_v23 = vsel %vm454_vm1, %v2356_v24, %v2360_v44 }
0x1178   : > { %v2364_v4 = vpop.permute.xlu1 %2363 }
0x1179   : > { %v2375_v18 = vsel %vm1601_vm6, %v2374_v23, %v2364_v4 }
0x117c   : > { %v2354_v0 = vpop.permute.xlu1 %2353 }
0x117d   : > { %v2373_v2 = vsel %vm2372_vm8, %v2371_v48, %v2354_v0 }
0x1180   : > { %v2368_v21 = vpop.permute.xlu1 %2367 }
0x1181   : > { %v2376_v28 = vsel %vm2372_vm8, %v2375_v18, %v2368_v21 }
0x1182   : > { %v2379_v39 = vcombine.low %v2373_v2, %v2376_v28 }
0x1184   : > { %v2386_v6 = vrot.slane %v2379_v39, %v3225_v9 }
0x1186   : > { %v2393_v8 = vrot.slane %v2386_v6, %v3225_v9 }
0x1188   : > { %2399 = vst.msk [vmem:[%s3166_s10] sm:$0x3] %vm2397_vm9, %v2393_v8 }
0x1189 PF: > { %s18_s9 = sadd.s32 1, %s3019_s9   ;;  %s3622_s24 = sld [smem:[#allocation3_spill]] }
0x118a   : > { %p15_p9 = scmp.ge.s32.totalorder %s18_s9, 6   ;;  %s3623_s25 = sld [smem:[#allocation4_spill]] }
0x118b   : > { %s3624_s27 = smov %s3011_s29  ;;  %s3625_s28 = smov %s3015_s30 }
0x118c   :  { %17 = sbr.rel (!%p15_p9) target bundleno = 4 (0x4), region = 108 }
0x118f   : > { %s3626_s29 = smov %s3622_s24 }
0x1190   : > { %s3627_s30 = smov %s3623_s25 }

</bundles_post_ra>
